<compile_context>
chip_gen: v5e
topology: v5e:2x2
jax: 0.10.0
libtpu: 0.0.40
codegen_flags: <defaults>
</compile_context>

<pallas_src>
import numpy as np
import jax
import jax.numpy as jnp
from jax.experimental import pallas as pl
from jax.experimental.pallas import tpu as pltpu

VOCAB = 16
EMBED = 32
HIDDEN = 32
SEQ = 8
N_MAX = 4  # max number of children per node (padded with zero-slot children)


# ---------------------------------------------------------------------------
# Tree container + host-side schedule (topological levels)
# ---------------------------------------------------------------------------
class Tree:
    def __init__(self, label, children=()):
        self._label = label
        self.children = list(children)

    def label(self):
        return self._label

    def __iter__(self):
        return iter(self.children)


def build_schedule(tree):
    """Flatten the tree into per-level batches of nodes.

    Slot layout of the in-kernel state buffer:
      slot 0              : permanent zero state (missing / leaf children)
      slot nid+1          : node nid
      slot n_nodes+1      : trash slot (padded level positions write here)
    """
    nodes = []

    def visit(t):
        if isinstance(t, Tree):
            ch = [visit(c) for c in t.children]
            label = t.label()
        else:
            ch = []
            label = t
        nid = len(nodes)
        nodes.append({"label": int(label), "children": ch})
        return nid

    root = visit(tree)
    n = len(nodes)

    level = [0] * n
    for nid in range(n):  # post-order: children precede parents
        ch = nodes[nid]["children"]
        if ch:
            level[nid] = 1 + max(level[c] for c in ch)

    num_levels = max(level) + 1
    by_level = [[] for _ in range(num_levels)]
    for nid in range(n):
        by_level[level[nid]].append(nid)

    max_children = max((len(nd["children"]) for nd in nodes), default=0)
    assert max_children <= N_MAX, "increase N_MAX"

    max_width = max(len(lv) for lv in by_level)
    max_width = int(-(-max_width // 8) * 8)          # round up to sublane multiple

    trash = n + 1
    num_slots = int(-(-(n + 2) // 8) * 8)

    child_idx = np.zeros((num_levels, max_width, N_MAX), np.int32)   # 0 -> zero slot
    node_slot = np.full((num_levels, max_width), trash, np.int32)
    labels = np.zeros((num_levels, max_width), np.int32)
    valid = np.zeros((num_levels, max_width), np.float32)

    for lv, ids in enumerate(by_level):
        for pos, nid in enumerate(ids):
            node_slot[lv, pos] = nid + 1
            labels[lv, pos] = nodes[nid]["label"]
            valid[lv, pos] = 1.0
            for k, c in enumerate(nodes[nid]["children"]):
                child_idx[lv, pos, k] = c + 1

    root_level = level[root]
    root_pos = by_level[root_level].index(root)

    return dict(
        num_levels=num_levels, max_width=max_width, num_slots=num_slots,
        child_idx=child_idx.reshape(-1), node_slot=node_slot.reshape(-1),
        labels=labels, valid=valid,
        root_level=root_level, root_pos=root_pos,
    )


# ---------------------------------------------------------------------------
# Pallas kernel: one grid step == one tree level (batched over nodes)
# ---------------------------------------------------------------------------
def make_tree_lstm(num_levels, max_width, num_slots):
    H = HIDDEN
    E = EMBED
    MW = max_width

    def kernel(child_idx_ref, node_slot_ref,                 # scalar prefetch (SMEM)
               x_ref, wbig_ref, bbig_ref, wfh_ref, bfh_ref,  # inputs
               c_out_ref, h_out_ref,                         # outputs
               state_c, state_h, cc_buf, ch_buf):            # VMEM scratch
        l = pl.program_id(0)

        # Zero the state buffer (slot 0 must be the zero state) before level 0.
        @pl.when(l == 0)
        def _():
            state_c[...] = jnp.zeros_like(state_c)
            state_h[...] = jnp.zeros_like(state_h)

        # ---- gather child states -----------------------------------------
        # cc_buf / ch_buf row (k*MW + m) holds child k of node m.
        base = l * (MW * N_MAX)
        for k in range(N_MAX):
            for m in range(MW):
                idx = child_idx_ref[base + m * N_MAX + k]
                row = k * MW + m
                cc_buf[pl.ds(row, 1), :] = state_c[pl.ds(idx, 1), :]
                ch_buf[pl.ds(row, 1), :] = state_h[pl.ds(idx, 1), :]

        x = x_ref[0]                         # (MW, E)
        child_c = cc_buf[...]                # (N_MAX*MW, H)
        child_h = ch_buf[...]                # (N_MAX*MW, H)

        # child_h_sum per node
        child_h_sum = jnp.zeros((MW, H), jnp.float32)
        for k in range(N_MAX):
            child_h_sum = child_h_sum + child_h[k * MW:(k + 1) * MW, :]

        # ---- fused lane-dense GEMM: [iou | fx] -----------------------------
        z = jnp.concatenate([x, child_h_sum], axis=1)        # (MW, E + H)
        y = (jnp.dot(z, wbig_ref[...], preferred_element_type=jnp.float32)
             + bbig_ref[...])                                # (MW, 4H) = (MW, 128)

        i = jax.nn.sigmoid(y[:, 0:H])
        o = jax.nn.sigmoid(y[:, H:2 * H])
        u = jnp.tanh(y[:, 2 * H:3 * H])
        fx = y[:, 3 * H:4 * H]                               # (MW, H)

        # ---- forget gates over all children in one matmul ------------------
        fh_all = (jnp.dot(child_h, wfh_ref[...],
                          preferred_element_type=jnp.float32)
                  + bfh_ref[...])                            # (N_MAX*MW, H)

        c_add = jnp.zeros((MW, H), jnp.float32)
        for k in range(N_MAX):
            f_k = jax.nn.sigmoid(fh_all[k * MW:(k + 1) * MW, :] + fx)
            c_add = c_add + f_k * child_c[k * MW:(k + 1) * MW, :]

        c = i * u + c_add                                    # (MW, H)
        h = o * jnp.tanh(c)                                  # (MW, H)

        # ---- scatter results into the state buffer -------------------------
        for m in range(MW):
            slot = node_slot_ref[l * MW + m]
            state_c[pl.ds(slot, 1), :] = c[m:m + 1, :]
            state_h[pl.ds(slot, 1), :] = h[m:m + 1, :]

        # ---- emit the final level's batch (root lives there) ---------------
        @pl.when(l == pl.num_programs(0) - 1)
        def _():
            c_out_ref[...] = c
            h_out_ref[...] = h

    resident = lambda l, *_: (0, 0)   # same block every level -> stays in VMEM

    grid_spec = pltpu.PrefetchScalarGridSpec(
        num_scalar_prefetch=2,
        grid=(num_levels,),
        in_specs=[
            pl.BlockSpec((1, MW, E), lambda l, *_: (l, 0, 0)),   # x per level
            pl.BlockSpec((E + H, 4 * H), resident),              # W_big
            pl.BlockSpec((1, 4 * H), resident),                  # b_big
            pl.BlockSpec((H, H), resident),                      # W_fh
            pl.BlockSpec((1, H), resident),                      # b_fh
        ],
        out_specs=(
            pl.BlockSpec((MW, H), resident),
            pl.BlockSpec((MW, H), resident),
        ),
        scratch_shapes=[
            pltpu.VMEM((num_slots, H), jnp.float32),     # state_c
            pltpu.VMEM((num_slots, H), jnp.float32),     # state_h
            pltpu.VMEM((N_MAX * MW, H), jnp.float32),    # gathered child_c
            pltpu.VMEM((N_MAX * MW, H), jnp.float32),    # gathered child_h
        ],
    )

    call = pl.pallas_call(
        kernel,
        out_shape=(jax.ShapeDtypeStruct((MW, H), jnp.float32),
                   jax.ShapeDtypeStruct((MW, H), jnp.float32)),
        grid_spec=grid_spec,
        compiler_params=pltpu.CompilerParams(
            dimension_semantics=("arbitrary",)),   # levels are sequential
    )
    return jax.jit(call)


# ---------------------------------------------------------------------------
# Host-side weight fusion:  W_big = [[W_ioux | W_fx], [W_iouh | 0]]
# ---------------------------------------------------------------------------
def fuse_params(params):
    E, H = EMBED, HIDDEN
    w_big = jnp.zeros((E + H, 4 * H), jnp.float32)
    w_big = w_big.at[:E, :3 * H].set(params["W_ioux"])
    w_big = w_big.at[:E, 3 * H:].set(params["W_fx"])
    w_big = w_big.at[E:, :3 * H].set(params["W_iouh"])
    b_big = jnp.concatenate(
        [params["b_ioux"] + params["b_iouh"], params["b_fx"]], axis=1)
    return w_big, b_big


# ---------------------------------------------------------------------------
# Pure-JAX reference (mirrors the PyTorch module exactly)
# ---------------------------------------------------------------------------
def node_forward_ref(params, x_emb, child_c, child_h):
    child_h_sum = jnp.sum(child_h, axis=0, keepdims=True)
    iou = (x_emb @ params["W_ioux"] + params["b_ioux"]
           + child_h_sum @ params["W_iouh"] + params["b_iouh"])
    i = jax.nn.sigmoid(iou[:, 0:HIDDEN])
    o = jax.nn.sigmoid(iou[:, HIDDEN:2 * HIDDEN])
    u = jnp.tanh(iou[:, 2 * HIDDEN:3 * HIDDEN])
    f = jax.nn.sigmoid(child_h @ params["W_fh"] + params["b_fh"]
                       + x_emb @ params["W_fx"] + params["b_fx"])
    fc = f * child_c
    c = i * u + jnp.sum(fc, axis=0, keepdims=True)
    h = o * jnp.tanh(c)
    return c, h


def tree_forward_ref(params, tree, token_ids):
    if isinstance(tree, Tree):
        states = [tree_forward_ref(params, ch, token_ids) for ch in tree]
        child_c = jnp.concatenate([s[0] for s in states], axis=0)
        child_h = jnp.concatenate([s[1] for s in states], axis=0)
        label = tree.label()
    else:
        child_c = jnp.zeros((1, HIDDEN), jnp.float32)
        child_h = jnp.zeros((1, HIDDEN), jnp.float32)
        label = tree
    x_emb = params["embedding"][token_ids[label]][None, :]
    return node_forward_ref(params, x_emb, child_c, child_h)


# ---------------------------------------------------------------------------
# Deterministic parameter init (Linear weights stored pre-transposed (in, out))
# ---------------------------------------------------------------------------
def init_params(key):
    ks = jax.random.split(key, 9)
    scale = 0.1
    return {
        "embedding": scale * jax.random.normal(ks[0], (VOCAB, EMBED), jnp.float32),
        "W_ioux": scale * jax.random.normal(ks[1], (EMBED, 3 * HIDDEN), jnp.float32),
        "b_ioux": scale * jax.random.normal(ks[2], (1, 3 * HIDDEN), jnp.float32),
        "W_iouh": scale * jax.random.normal(ks[3], (HIDDEN, 3 * HIDDEN), jnp.float32),
        "b_iouh": scale * jax.random.normal(ks[4], (1, 3 * HIDDEN), jnp.float32),
        "W_fx": scale * jax.random.normal(ks[5], (EMBED, HIDDEN), jnp.float32),
        "b_fx": scale * jax.random.normal(ks[6], (1, HIDDEN), jnp.float32),
        "W_fh": scale * jax.random.normal(ks[7], (HIDDEN, HIDDEN), jnp.float32),
        "b_fh": scale * jax.random.normal(ks[8], (1, HIDDEN), jnp.float32),
    }


if __name__ == "__main__":
    key = jax.random.PRNGKey(0)
    pkey, tkey = jax.random.split(key)
    params = init_params(pkey)

    token_ids = jax.random.randint(tkey, (SEQ,), 0, VOCAB)

    # small example tree over positions 0..7
    #          (0)
    #        /     \
    #     (1)       (4)
    #    /   \     / | \
    #   2     3   5  6  7     (leaves are int positions)
    tree = Tree(0, [Tree(1, [2, 3]), Tree(4, [5, 6, 7])])

    sched = build_schedule(tree)
    w_big, b_big = fuse_params(params)

    # Per-(level, position) embeddings; padded positions are zeroed (they only
    # write to the trash slot, but keep them tidy).
    tok = token_ids[jnp.asarray(sched["labels"])]                       # (L, MW)
    x_all = (params["embedding"][tok]
             * jnp.asarray(sched["valid"])[..., None]).astype(jnp.float32)

    run = make_tree_lstm(sched["num_levels"], sched["max_width"], sched["num_slots"])
    c_out, h_out = run(jnp.asarray(sched["child_idx"], dtype=jnp.int32),
                       jnp.asarray(sched["node_slot"], dtype=jnp.int32),
                       x_all, w_big, b_big, params["W_fh"], params["b_fh"])
    c_out = jax.block_until_ready(c_out)
    h_out = jax.block_until_ready(h_out)

    rp = sched["root_pos"]
    c_root = c_out[rp:rp + 1]
    h_root = h_out[rp:rp + 1]

    c_ref, h_ref = tree_forward_ref(params, tree, token_ids)
    np.testing.assert_allclose(np.asarray(c_root), np.asarray(c_ref),
                               rtol=1e-5, atol=1e-5)
    np.testing.assert_allclose(np.asarray(h_root), np.asarray(h_ref),
                               rtol=1e-5, atol=1e-5)

    print("KERNEL_OK")
</pallas_src>

<mosaic_0001>
module attributes {stable_mosaic.version = 11 : i64} {
  func.func @kernel(%arg0: i32, %arg1: memref<96xi32, #tpu.memory_space<smem>>, %arg2: memref<24xi32, #tpu.memory_space<smem>>, %arg3: memref<1x8x32xf32, #tpu.memory_space<vmem>>, %arg4: memref<64x128xf32, #tpu.memory_space<vmem>>, %arg5: memref<1x128xf32, #tpu.memory_space<vmem>>, %arg6: memref<32x32xf32, #tpu.memory_space<vmem>>, %arg7: memref<1x32xf32, #tpu.memory_space<vmem>>, %arg8: memref<8x32xf32, #tpu.memory_space<vmem>>, %arg9: memref<8x32xf32, #tpu.memory_space<vmem>>, %arg10: memref<16x32xf32, #tpu.memory_space<vmem>>, %arg11: memref<16x32xf32, #tpu.memory_space<vmem>>, %arg12: memref<32x32xf32, #tpu.memory_space<vmem>>, %arg13: memref<32x32xf32, #tpu.memory_space<vmem>>) attributes {dimension_semantics = [#tpu.dimension_semantics<arbitrary>], iteration_bounds = array<i64: 3>, scalar_prefetch = 2 : i64, scratch_operands = 4 : i64, tpu.core_type = #tpu.core_type<tc>, window_params = [{transform_indices = @transform_0, window_bounds = array<i64: 1, 8, 32>}, {pipeline_mode = #tpu.pipeline_mode<synchronous>, transform_indices = @transform_1, window_bounds = array<i64: 64, 128>}, {pipeline_mode = #tpu.pipeline_mode<synchronous>, transform_indices = @transform_2, window_bounds = array<i64: 1, 128>}, {pipeline_mode = #tpu.pipeline_mode<synchronous>, transform_indices = @transform_3, window_bounds = array<i64: 32, 32>}, {pipeline_mode = #tpu.pipeline_mode<synchronous>, transform_indices = @transform_4, window_bounds = array<i64: 1, 32>}, {pipeline_mode = #tpu.pipeline_mode<synchronous>, transform_indices = @transform_5, window_bounds = array<i64: 8, 32>}, {pipeline_mode = #tpu.pipeline_mode<synchronous>, transform_indices = @transform_6, window_bounds = array<i64: 8, 32>}]} {
    %c0_i32 = arith.constant 0 : i32
    %0 = arith.cmpi eq, %arg0, %c0_i32 : i32
    %1 = arith.extui %0 : i1 to i32
    %c0_i32_0 = arith.constant 0 : i32
    %2 = arith.cmpi ne, %1, %c0_i32_0 : i32
    scf.if %2 {
      %cst_270 = arith.constant 0.000000e+00 : f32
      %491 = vector.broadcast %cst_270 : f32 to vector<16x32xf32>
      %c0_271 = arith.constant 0 : index
      %c0_272 = arith.constant 0 : index
      %492 = vector.load %arg10[%c0_271, %c0_272] : memref<16x32xf32, #tpu.memory_space<vmem>>, vector<16x32xf32>
      tpu.vector_store %arg10[%c0_271, %c0_272], %491 {strides = array<i32>} : memref<16x32xf32, #tpu.memory_space<vmem>>, vector<16x32xf32>,
      %cst_273 = arith.constant 0.000000e+00 : f32
      %493 = vector.broadcast %cst_273 : f32 to vector<16x32xf32>
      %c0_274 = arith.constant 0 : index
      %c0_275 = arith.constant 0 : index
      %494 = vector.load %arg11[%c0_274, %c0_275] : memref<16x32xf32, #tpu.memory_space<vmem>>, vector<16x32xf32>
      tpu.vector_store %arg11[%c0_274, %c0_275], %493 {strides = array<i32>} : memref<16x32xf32, #tpu.memory_space<vmem>>, vector<16x32xf32>,
    } else {
    }
    %c32_i32 = arith.constant 32 : i32
    %3 = arith.muli %arg0, %c32_i32 : i32
    %c0_i32_1 = arith.constant 0 : i32
    %4 = arith.addi %3, %c0_i32_1 : i32
    %c0_i32_2 = arith.constant 0 : i32
    %5 = arith.addi %4, %c0_i32_2 : i32
    %6 = arith.index_cast %5 : i32 to index
    %7 = memref.load %arg1[%6] : memref<96xi32, #tpu.memory_space<smem>>
    %8 = arith.index_cast %7 : i32 to index
    %c0 = arith.constant 0 : index
    %9 = vector.load %arg10[%8, %c0] : memref<16x32xf32, #tpu.memory_space<vmem>>, vector<1x32xf32>
    %c0_3 = arith.constant 0 : index
    %c0_4 = arith.constant 0 : index
    %10 = vector.load %arg12[%c0_3, %c0_4] : memref<32x32xf32, #tpu.memory_space<vmem>>, vector<1x32xf32>
    tpu.vector_store %arg12[%c0_3, %c0_4], %9 {strides = array<i32>} : memref<32x32xf32, #tpu.memory_space<vmem>>, vector<1x32xf32>,
    %11 = arith.index_cast %7 : i32 to index
    %c0_5 = arith.constant 0 : index
    %12 = vector.load %arg11[%11, %c0_5] : memref<16x32xf32, #tpu.memory_space<vmem>>, vector<1x32xf32>
    %c0_6 = arith.constant 0 : index
    %c0_7 = arith.constant 0 : index
    %13 = vector.load %arg13[%c0_6, %c0_7] : memref<32x32xf32, #tpu.memory_space<vmem>>, vector<1x32xf32>
    tpu.vector_store %arg13[%c0_6, %c0_7], %12 {strides = array<i32>} : memref<32x32xf32, #tpu.memory_space<vmem>>, vector<1x32xf32>,
    %c4_i32 = arith.constant 4 : i32
    %14 = arith.addi %3, %c4_i32 : i32
    %c0_i32_8 = arith.constant 0 : i32
    %15 = arith.addi %14, %c0_i32_8 : i32
    %16 = arith.index_cast %15 : i32 to index
    %17 = memref.load %arg1[%16] : memref<96xi32, #tpu.memory_space<smem>>
    %18 = arith.index_cast %17 : i32 to index
    %c0_9 = arith.constant 0 : index
    %19 = vector.load %arg10[%18, %c0_9] : memref<16x32xf32, #tpu.memory_space<vmem>>, vector<1x32xf32>
    %c1 = arith.constant 1 : index
    %c0_10 = arith.constant 0 : index
    %20 = vector.load %arg12[%c1, %c0_10] : memref<32x32xf32, #tpu.memory_space<vmem>>, vector<1x32xf32>
    tpu.vector_store %arg12[%c1, %c0_10], %19 {strides = array<i32>} : memref<32x32xf32, #tpu.memory_space<vmem>>, vector<1x32xf32>,
    %21 = arith.index_cast %17 : i32 to index
    %c0_11 = arith.constant 0 : index
    %22 = vector.load %arg11[%21, %c0_11] : memref<16x32xf32, #tpu.memory_space<vmem>>, vector<1x32xf32>
    %c1_12 = arith.constant 1 : index
    %c0_13 = arith.constant 0 : index
    %23 = vector.load %arg13[%c1_12, %c0_13] : memref<32x32xf32, #tpu.memory_space<vmem>>, vector<1x32xf32>
    tpu.vector_store %arg13[%c1_12, %c0_13], %22 {strides = array<i32>} : memref<32x32xf32, #tpu.memory_space<vmem>>, vector<1x32xf32>,
    %c8_i32 = arith.constant 8 : i32
    %24 = arith.addi %3, %c8_i32 : i32
    %c0_i32_14 = arith.constant 0 : i32
    %25 = arith.addi %24, %c0_i32_14 : i32
    %26 = arith.index_cast %25 : i32 to index
    %27 = memref.load %arg1[%26] : memref<96xi32, #tpu.memory_space<smem>>
    %28 = arith.index_cast %27 : i32 to index
    %c0_15 = arith.constant 0 : index
    %29 = vector.load %arg10[%28, %c0_15] : memref<16x32xf32, #tpu.memory_space<vmem>>, vector<1x32xf32>
    %c2 = arith.constant 2 : index
    %c0_16 = arith.constant 0 : index
    %30 = vector.load %arg12[%c2, %c0_16] : memref<32x32xf32, #tpu.memory_space<vmem>>, vector<1x32xf32>
    tpu.vector_store %arg12[%c2, %c0_16], %29 {strides = array<i32>} : memref<32x32xf32, #tpu.memory_space<vmem>>, vector<1x32xf32>,
    %31 = arith.index_cast %27 : i32 to index
    %c0_17 = arith.constant 0 : index
    %32 = vector.load %arg11[%31, %c0_17] : memref<16x32xf32, #tpu.memory_space<vmem>>, vector<1x32xf32>
    %c2_18 = arith.constant 2 : index
    %c0_19 = arith.constant 0 : index
    %33 = vector.load %arg13[%c2_18, %c0_19] : memref<32x32xf32, #tpu.memory_space<vmem>>, vector<1x32xf32>
    tpu.vector_store %arg13[%c2_18, %c0_19], %32 {strides = array<i32>} : memref<32x32xf32, #tpu.memory_space<vmem>>, vector<1x32xf32>,
    %c12_i32 = arith.constant 12 : i32
    %34 = arith.addi %3, %c12_i32 : i32
    %c0_i32_20 = arith.constant 0 : i32
    %35 = arith.addi %34, %c0_i32_20 : i32
    %36 = arith.index_cast %35 : i32 to index
    %37 = memref.load %arg1[%36] : memref<96xi32, #tpu.memory_space<smem>>
    %38 = arith.index_cast %37 : i32 to index
    %c0_21 = arith.constant 0 : index
    %39 = vector.load %arg10[%38, %c0_21] : memref<16x32xf32, #tpu.memory_space<vmem>>, vector<1x32xf32>
    %c3 = arith.constant 3 : index
    %c0_22 = arith.constant 0 : index
    %40 = vector.load %arg12[%c3, %c0_22] : memref<32x32xf32, #tpu.memory_space<vmem>>, vector<1x32xf32>
    tpu.vector_store %arg12[%c3, %c0_22], %39 {strides = array<i32>} : memref<32x32xf32, #tpu.memory_space<vmem>>, vector<1x32xf32>,
    %41 = arith.index_cast %37 : i32 to index
    %c0_23 = arith.constant 0 : index
    %42 = vector.load %arg11[%41, %c0_23] : memref<16x32xf32, #tpu.memory_space<vmem>>, vector<1x32xf32>
    %c3_24 = arith.constant 3 : index
    %c0_25 = arith.constant 0 : index
    %43 = vector.load %arg13[%c3_24, %c0_25] : memref<32x32xf32, #tpu.memory_space<vmem>>, vector<1x32xf32>
    tpu.vector_store %arg13[%c3_24, %c0_25], %42 {strides = array<i32>} : memref<32x32xf32, #tpu.memory_space<vmem>>, vector<1x32xf32>,
    %c16_i32 = arith.constant 16 : i32
    %44 = arith.addi %3, %c16_i32 : i32
    %c0_i32_26 = arith.constant 0 : i32
    %45 = arith.addi %44, %c0_i32_26 : i32
    %46 = arith.index_cast %45 : i32 to index
    %47 = memref.load %arg1[%46] : memref<96xi32, #tpu.memory_space<smem>>
    %48 = arith.index_cast %47 : i32 to index
    %c0_27 = arith.constant 0 : index
    %49 = vector.load %arg10[%48, %c0_27] : memref<16x32xf32, #tpu.memory_space<vmem>>, vector<1x32xf32>
    %c4 = arith.constant 4 : index
    %c0_28 = arith.constant 0 : index
    %50 = vector.load %arg12[%c4, %c0_28] : memref<32x32xf32, #tpu.memory_space<vmem>>, vector<1x32xf32>
    tpu.vector_store %arg12[%c4, %c0_28], %49 {strides = array<i32>} : memref<32x32xf32, #tpu.memory_space<vmem>>, vector<1x32xf32>,
    %51 = arith.index_cast %47 : i32 to index
    %c0_29 = arith.constant 0 : index
    %52 = vector.load %arg11[%51, %c0_29] : memref<16x32xf32, #tpu.memory_space<vmem>>, vector<1x32xf32>
    %c4_30 = arith.constant 4 : index
    %c0_31 = arith.constant 0 : index
    %53 = vector.load %arg13[%c4_30, %c0_31] : memref<32x32xf32, #tpu.memory_space<vmem>>, vector<1x32xf32>
    tpu.vector_store %arg13[%c4_30, %c0_31], %52 {strides = array<i32>} : memref<32x32xf32, #tpu.memory_space<vmem>>, vector<1x32xf32>,
    %c20_i32 = arith.constant 20 : i32
    %54 = arith.addi %3, %c20_i32 : i32
    %c0_i32_32 = arith.constant 0 : i32
    %55 = arith.addi %54, %c0_i32_32 : i32
    %56 = arith.index_cast %55 : i32 to index
    %57 = memref.load %arg1[%56] : memref<96xi32, #tpu.memory_space<smem>>
    %58 = arith.index_cast %57 : i32 to index
    %c0_33 = arith.constant 0 : index
    %59 = vector.load %arg10[%58, %c0_33] : memref<16x32xf32, #tpu.memory_space<vmem>>, vector<1x32xf32>
    %c5 = arith.constant 5 : index
    %c0_34 = arith.constant 0 : index
    %60 = vector.load %arg12[%c5, %c0_34] : memref<32x32xf32, #tpu.memory_space<vmem>>, vector<1x32xf32>
    tpu.vector_store %arg12[%c5, %c0_34], %59 {strides = array<i32>} : memref<32x32xf32, #tpu.memory_space<vmem>>, vector<1x32xf32>,
    %61 = arith.index_cast %57 : i32 to index
    %c0_35 = arith.constant 0 : index
    %62 = vector.load %arg11[%61, %c0_35] : memref<16x32xf32, #tpu.memory_space<vmem>>, vector<1x32xf32>
    %c5_36 = arith.constant 5 : index
    %c0_37 = arith.constant 0 : index
    %63 = vector.load %arg13[%c5_36, %c0_37] : memref<32x32xf32, #tpu.memory_space<vmem>>, vector<1x32xf32>
    tpu.vector_store %arg13[%c5_36, %c0_37], %62 {strides = array<i32>} : memref<32x32xf32, #tpu.memory_space<vmem>>, vector<1x32xf32>,
    %c24_i32 = arith.constant 24 : i32
    %64 = arith.addi %3, %c24_i32 : i32
    %c0_i32_38 = arith.constant 0 : i32
    %65 = arith.addi %64, %c0_i32_38 : i32
    %66 = arith.index_cast %65 : i32 to index
    %67 = memref.load %arg1[%66] : memref<96xi32, #tpu.memory_space<smem>>
    %68 = arith.index_cast %67 : i32 to index
    %c0_39 = arith.constant 0 : index
    %69 = vector.load %arg10[%68, %c0_39] : memref<16x32xf32, #tpu.memory_space<vmem>>, vector<1x32xf32>
    %c6 = arith.constant 6 : index
    %c0_40 = arith.constant 0 : index
    %70 = vector.load %arg12[%c6, %c0_40] : memref<32x32xf32, #tpu.memory_space<vmem>>, vector<1x32xf32>
    tpu.vector_store %arg12[%c6, %c0_40], %69 {strides = array<i32>} : memref<32x32xf32, #tpu.memory_space<vmem>>, vector<1x32xf32>,
    %71 = arith.index_cast %67 : i32 to index
    %c0_41 = arith.constant 0 : index
    %72 = vector.load %arg11[%71, %c0_41] : memref<16x32xf32, #tpu.memory_space<vmem>>, vector<1x32xf32>
    %c6_42 = arith.constant 6 : index
    %c0_43 = arith.constant 0 : index
    %73 = vector.load %arg13[%c6_42, %c0_43] : memref<32x32xf32, #tpu.memory_space<vmem>>, vector<1x32xf32>
    tpu.vector_store %arg13[%c6_42, %c0_43], %72 {strides = array<i32>} : memref<32x32xf32, #tpu.memory_space<vmem>>, vector<1x32xf32>,
    %c28_i32 = arith.constant 28 : i32
    %74 = arith.addi %3, %c28_i32 : i32
    %c0_i32_44 = arith.constant 0 : i32
    %75 = arith.addi %74, %c0_i32_44 : i32
    %76 = arith.index_cast %75 : i32 to index
    %77 = memref.load %arg1[%76] : memref<96xi32, #tpu.memory_space<smem>>
    %78 = arith.index_cast %77 : i32 to index
    %c0_45 = arith.constant 0 : index
    %79 = vector.load %arg10[%78, %c0_45] : memref<16x32xf32, #tpu.memory_space<vmem>>, vector<1x32xf32>
    %c7 = arith.constant 7 : index
    %c0_46 = arith.constant 0 : index
    %80 = vector.load %arg12[%c7, %c0_46] : memref<32x32xf32, #tpu.memory_space<vmem>>, vector<1x32xf32>
    tpu.vector_store %arg12[%c7, %c0_46], %79 {strides = array<i32>} : memref<32x32xf32, #tpu.memory_space<vmem>>, vector<1x32xf32>,
    %81 = arith.index_cast %77 : i32 to index
    %c0_47 = arith.constant 0 : index
    %82 = vector.load %arg11[%81, %c0_47] : memref<16x32xf32, #tpu.memory_space<vmem>>, vector<1x32xf32>
    %c7_48 = arith.constant 7 : index
    %c0_49 = arith.constant 0 : index
    %83 = vector.load %arg13[%c7_48, %c0_49] : memref<32x32xf32, #tpu.memory_space<vmem>>, vector<1x32xf32>
    tpu.vector_store %arg13[%c7_48, %c0_49], %82 {strides = array<i32>} : memref<32x32xf32, #tpu.memory_space<vmem>>, vector<1x32xf32>,
    %c0_i32_50 = arith.constant 0 : i32
    %84 = arith.addi %3, %c0_i32_50 : i32
    %c1_i32 = arith.constant 1 : i32
    %85 = arith.addi %84, %c1_i32 : i32
    %86 = arith.index_cast %85 : i32 to index
    %87 = memref.load %arg1[%86] : memref<96xi32, #tpu.memory_space<smem>>
    %88 = arith.index_cast %87 : i32 to index
    %c0_51 = arith.constant 0 : index
    %89 = vector.load %arg10[%88, %c0_51] : memref<16x32xf32, #tpu.memory_space<vmem>>, vector<1x32xf32>
    %c8 = arith.constant 8 : index
    %c0_52 = arith.constant 0 : index
    %90 = vector.load %arg12[%c8, %c0_52] : memref<32x32xf32, #tpu.memory_space<vmem>>, vector<1x32xf32>
    tpu.vector_store %arg12[%c8, %c0_52], %89 {strides = array<i32>} : memref<32x32xf32, #tpu.memory_space<vmem>>, vector<1x32xf32>,
    %91 = arith.index_cast %87 : i32 to index
    %c0_53 = arith.constant 0 : index
    %92 = vector.load %arg11[%91, %c0_53] : memref<16x32xf32, #tpu.memory_space<vmem>>, vector<1x32xf32>
    %c8_54 = arith.constant 8 : index
    %c0_55 = arith.constant 0 : index
    %93 = vector.load %arg13[%c8_54, %c0_55] : memref<32x32xf32, #tpu.memory_space<vmem>>, vector<1x32xf32>
    tpu.vector_store %arg13[%c8_54, %c0_55], %92 {strides = array<i32>} : memref<32x32xf32, #tpu.memory_space<vmem>>, vector<1x32xf32>,
    %c4_i32_56 = arith.constant 4 : i32
    %94 = arith.addi %3, %c4_i32_56 : i32
    %c1_i32_57 = arith.constant 1 : i32
    %95 = arith.addi %94, %c1_i32_57 : i32
    %96 = arith.index_cast %95 : i32 to index
    %97 = memref.load %arg1[%96] : memref<96xi32, #tpu.memory_space<smem>>
    %98 = arith.index_cast %97 : i32 to index
    %c0_58 = arith.constant 0 : index
    %99 = vector.load %arg10[%98, %c0_58] : memref<16x32xf32, #tpu.memory_space<vmem>>, vector<1x32xf32>
    %c9 = arith.constant 9 : index
    %c0_59 = arith.constant 0 : index
    %100 = vector.load %arg12[%c9, %c0_59] : memref<32x32xf32, #tpu.memory_space<vmem>>, vector<1x32xf32>
    tpu.vector_store %arg12[%c9, %c0_59], %99 {strides = array<i32>} : memref<32x32xf32, #tpu.memory_space<vmem>>, vector<1x32xf32>,
    %101 = arith.index_cast %97 : i32 to index
    %c0_60 = arith.constant 0 : index
    %102 = vector.load %arg11[%101, %c0_60] : memref<16x32xf32, #tpu.memory_space<vmem>>, vector<1x32xf32>
    %c9_61 = arith.constant 9 : index
    %c0_62 = arith.constant 0 : index
    %103 = vector.load %arg13[%c9_61, %c0_62] : memref<32x32xf32, #tpu.memory_space<vmem>>, vector<1x32xf32>
    tpu.vector_store %arg13[%c9_61, %c0_62], %102 {strides = array<i32>} : memref<32x32xf32, #tpu.memory_space<vmem>>, vector<1x32xf32>,
    %c8_i32_63 = arith.constant 8 : i32
    %104 = arith.addi %3, %c8_i32_63 : i32
    %c1_i32_64 = arith.constant 1 : i32
    %105 = arith.addi %104, %c1_i32_64 : i32
    %106 = arith.index_cast %105 : i32 to index
    %107 = memref.load %arg1[%106] : memref<96xi32, #tpu.memory_space<smem>>
    %108 = arith.index_cast %107 : i32 to index
    %c0_65 = arith.constant 0 : index
    %109 = vector.load %arg10[%108, %c0_65] : memref<16x32xf32, #tpu.memory_space<vmem>>, vector<1x32xf32>
    %c10 = arith.constant 10 : index
    %c0_66 = arith.constant 0 : index
    %110 = vector.load %arg12[%c10, %c0_66] : memref<32x32xf32, #tpu.memory_space<vmem>>, vector<1x32xf32>
    tpu.vector_store %arg12[%c10, %c0_66], %109 {strides = array<i32>} : memref<32x32xf32, #tpu.memory_space<vmem>>, vector<1x32xf32>,
    %111 = arith.index_cast %107 : i32 to index
    %c0_67 = arith.constant 0 : index
    %112 = vector.load %arg11[%111, %c0_67] : memref<16x32xf32, #tpu.memory_space<vmem>>, vector<1x32xf32>
    %c10_68 = arith.constant 10 : index
    %c0_69 = arith.constant 0 : index
    %113 = vector.load %arg13[%c10_68, %c0_69] : memref<32x32xf32, #tpu.memory_space<vmem>>, vector<1x32xf32>
    tpu.vector_store %arg13[%c10_68, %c0_69], %112 {strides = array<i32>} : memref<32x32xf32, #tpu.memory_space<vmem>>, vector<1x32xf32>,
    %c12_i32_70 = arith.constant 12 : i32
    %114 = arith.addi %3, %c12_i32_70 : i32
    %c1_i32_71 = arith.constant 1 : i32
    %115 = arith.addi %114, %c1_i32_71 : i32
    %116 = arith.index_cast %115 : i32 to index
    %117 = memref.load %arg1[%116] : memref<96xi32, #tpu.memory_space<smem>>
    %118 = arith.index_cast %117 : i32 to index
    %c0_72 = arith.constant 0 : index
    %119 = vector.load %arg10[%118, %c0_72] : memref<16x32xf32, #tpu.memory_space<vmem>>, vector<1x32xf32>
    %c11 = arith.constant 11 : index
    %c0_73 = arith.constant 0 : index
    %120 = vector.load %arg12[%c11, %c0_73] : memref<32x32xf32, #tpu.memory_space<vmem>>, vector<1x32xf32>
    tpu.vector_store %arg12[%c11, %c0_73], %119 {strides = array<i32>} : memref<32x32xf32, #tpu.memory_space<vmem>>, vector<1x32xf32>,
    %121 = arith.index_cast %117 : i32 to index
    %c0_74 = arith.constant 0 : index
    %122 = vector.load %arg11[%121, %c0_74] : memref<16x32xf32, #tpu.memory_space<vmem>>, vector<1x32xf32>
    %c11_75 = arith.constant 11 : index
    %c0_76 = arith.constant 0 : index
    %123 = vector.load %arg13[%c11_75, %c0_76] : memref<32x32xf32, #tpu.memory_space<vmem>>, vector<1x32xf32>
    tpu.vector_store %arg13[%c11_75, %c0_76], %122 {strides = array<i32>} : memref<32x32xf32, #tpu.memory_space<vmem>>, vector<1x32xf32>,
    %c16_i32_77 = arith.constant 16 : i32
    %124 = arith.addi %3, %c16_i32_77 : i32
    %c1_i32_78 = arith.constant 1 : i32
    %125 = arith.addi %124, %c1_i32_78 : i32
    %126 = arith.index_cast %125 : i32 to index
    %127 = memref.load %arg1[%126] : memref<96xi32, #tpu.memory_space<smem>>
    %128 = arith.index_cast %127 : i32 to index
    %c0_79 = arith.constant 0 : index
    %129 = vector.load %arg10[%128, %c0_79] : memref<16x32xf32, #tpu.memory_space<vmem>>, vector<1x32xf32>
    %c12 = arith.constant 12 : index
    %c0_80 = arith.constant 0 : index
    %130 = vector.load %arg12[%c12, %c0_80] : memref<32x32xf32, #tpu.memory_space<vmem>>, vector<1x32xf32>
    tpu.vector_store %arg12[%c12, %c0_80], %129 {strides = array<i32>} : memref<32x32xf32, #tpu.memory_space<vmem>>, vector<1x32xf32>,
    %131 = arith.index_cast %127 : i32 to index
    %c0_81 = arith.constant 0 : index
    %132 = vector.load %arg11[%131, %c0_81] : memref<16x32xf32, #tpu.memory_space<vmem>>, vector<1x32xf32>
    %c12_82 = arith.constant 12 : index
    %c0_83 = arith.constant 0 : index
    %133 = vector.load %arg13[%c12_82, %c0_83] : memref<32x32xf32, #tpu.memory_space<vmem>>, vector<1x32xf32>
    tpu.vector_store %arg13[%c12_82, %c0_83], %132 {strides = array<i32>} : memref<32x32xf32, #tpu.memory_space<vmem>>, vector<1x32xf32>,
    %c20_i32_84 = arith.constant 20 : i32
    %134 = arith.addi %3, %c20_i32_84 : i32
    %c1_i32_85 = arith.constant 1 : i32
    %135 = arith.addi %134, %c1_i32_85 : i32
    %136 = arith.index_cast %135 : i32 to index
    %137 = memref.load %arg1[%136] : memref<96xi32, #tpu.memory_space<smem>>
    %138 = arith.index_cast %137 : i32 to index
    %c0_86 = arith.constant 0 : index
    %139 = vector.load %arg10[%138, %c0_86] : memref<16x32xf32, #tpu.memory_space<vmem>>, vector<1x32xf32>
    %c13 = arith.constant 13 : index
    %c0_87 = arith.constant 0 : index
    %140 = vector.load %arg12[%c13, %c0_87] : memref<32x32xf32, #tpu.memory_space<vmem>>, vector<1x32xf32>
    tpu.vector_store %arg12[%c13, %c0_87], %139 {strides = array<i32>} : memref<32x32xf32, #tpu.memory_space<vmem>>, vector<1x32xf32>,
    %141 = arith.index_cast %137 : i32 to index
    %c0_88 = arith.constant 0 : index
    %142 = vector.load %arg11[%141, %c0_88] : memref<16x32xf32, #tpu.memory_space<vmem>>, vector<1x32xf32>
    %c13_89 = arith.constant 13 : index
    %c0_90 = arith.constant 0 : index
    %143 = vector.load %arg13[%c13_89, %c0_90] : memref<32x32xf32, #tpu.memory_space<vmem>>, vector<1x32xf32>
    tpu.vector_store %arg13[%c13_89, %c0_90], %142 {strides = array<i32>} : memref<32x32xf32, #tpu.memory_space<vmem>>, vector<1x32xf32>,
    %c24_i32_91 = arith.constant 24 : i32
    %144 = arith.addi %3, %c24_i32_91 : i32
    %c1_i32_92 = arith.constant 1 : i32
    %145 = arith.addi %144, %c1_i32_92 : i32
    %146 = arith.index_cast %145 : i32 to index
    %147 = memref.load %arg1[%146] : memref<96xi32, #tpu.memory_space<smem>>
    %148 = arith.index_cast %147 : i32 to index
    %c0_93 = arith.constant 0 : index
    %149 = vector.load %arg10[%148, %c0_93] : memref<16x32xf32, #tpu.memory_space<vmem>>, vector<1x32xf32>
    %c14 = arith.constant 14 : index
    %c0_94 = arith.constant 0 : index
    %150 = vector.load %arg12[%c14, %c0_94] : memref<32x32xf32, #tpu.memory_space<vmem>>, vector<1x32xf32>
    tpu.vector_store %arg12[%c14, %c0_94], %149 {strides = array<i32>} : memref<32x32xf32, #tpu.memory_space<vmem>>, vector<1x32xf32>,
    %151 = arith.index_cast %147 : i32 to index
    %c0_95 = arith.constant 0 : index
    %152 = vector.load %arg11[%151, %c0_95] : memref<16x32xf32, #tpu.memory_space<vmem>>, vector<1x32xf32>
    %c14_96 = arith.constant 14 : index
    %c0_97 = arith.constant 0 : index
    %153 = vector.load %arg13[%c14_96, %c0_97] : memref<32x32xf32, #tpu.memory_space<vmem>>, vector<1x32xf32>
    tpu.vector_store %arg13[%c14_96, %c0_97], %152 {strides = array<i32>} : memref<32x32xf32, #tpu.memory_space<vmem>>, vector<1x32xf32>,
    %c28_i32_98 = arith.constant 28 : i32
    %154 = arith.addi %3, %c28_i32_98 : i32
    %c1_i32_99 = arith.constant 1 : i32
    %155 = arith.addi %154, %c1_i32_99 : i32
    %156 = arith.index_cast %155 : i32 to index
    %157 = memref.load %arg1[%156] : memref<96xi32, #tpu.memory_space<smem>>
    %158 = arith.index_cast %157 : i32 to index
    %c0_100 = arith.constant 0 : index
    %159 = vector.load %arg10[%158, %c0_100] : memref<16x32xf32, #tpu.memory_space<vmem>>, vector<1x32xf32>
    %c15 = arith.constant 15 : index
    %c0_101 = arith.constant 0 : index
    %160 = vector.load %arg12[%c15, %c0_101] : memref<32x32xf32, #tpu.memory_space<vmem>>, vector<1x32xf32>
    tpu.vector_store %arg12[%c15, %c0_101], %159 {strides = array<i32>} : memref<32x32xf32, #tpu.memory_space<vmem>>, vector<1x32xf32>,
    %161 = arith.index_cast %157 : i32 to index
    %c0_102 = arith.constant 0 : index
    %162 = vector.load %arg11[%161, %c0_102] : memref<16x32xf32, #tpu.memory_space<vmem>>, vector<1x32xf32>
    %c15_103 = arith.constant 15 : index
    %c0_104 = arith.constant 0 : index
    %163 = vector.load %arg13[%c15_103, %c0_104] : memref<32x32xf32, #tpu.memory_space<vmem>>, vector<1x32xf32>
    tpu.vector_store %arg13[%c15_103, %c0_104], %162 {strides = array<i32>} : memref<32x32xf32, #tpu.memory_space<vmem>>, vector<1x32xf32>,
    %c0_i32_105 = arith.constant 0 : i32
    %164 = arith.addi %3, %c0_i32_105 : i32
    %c2_i32 = arith.constant 2 : i32
    %165 = arith.addi %164, %c2_i32 : i32
    %166 = arith.index_cast %165 : i32 to index
    %167 = memref.load %arg1[%166] : memref<96xi32, #tpu.memory_space<smem>>
    %168 = arith.index_cast %167 : i32 to index
    %c0_106 = arith.constant 0 : index
    %169 = vector.load %arg10[%168, %c0_106] : memref<16x32xf32, #tpu.memory_space<vmem>>, vector<1x32xf32>
    %c16 = arith.constant 16 : index
    %c0_107 = arith.constant 0 : index
    %170 = vector.load %arg12[%c16, %c0_107] : memref<32x32xf32, #tpu.memory_space<vmem>>, vector<1x32xf32>
    tpu.vector_store %arg12[%c16, %c0_107], %169 {strides = array<i32>} : memref<32x32xf32, #tpu.memory_space<vmem>>, vector<1x32xf32>,
    %171 = arith.index_cast %167 : i32 to index
    %c0_108 = arith.constant 0 : index
    %172 = vector.load %arg11[%171, %c0_108] : memref<16x32xf32, #tpu.memory_space<vmem>>, vector<1x32xf32>
    %c16_109 = arith.constant 16 : index
    %c0_110 = arith.constant 0 : index
    %173 = vector.load %arg13[%c16_109, %c0_110] : memref<32x32xf32, #tpu.memory_space<vmem>>, vector<1x32xf32>
    tpu.vector_store %arg13[%c16_109, %c0_110], %172 {strides = array<i32>} : memref<32x32xf32, #tpu.memory_space<vmem>>, vector<1x32xf32>,
    %c4_i32_111 = arith.constant 4 : i32
    %174 = arith.addi %3, %c4_i32_111 : i32
    %c2_i32_112 = arith.constant 2 : i32
    %175 = arith.addi %174, %c2_i32_112 : i32
    %176 = arith.index_cast %175 : i32 to index
    %177 = memref.load %arg1[%176] : memref<96xi32, #tpu.memory_space<smem>>
    %178 = arith.index_cast %177 : i32 to index
    %c0_113 = arith.constant 0 : index
    %179 = vector.load %arg10[%178, %c0_113] : memref<16x32xf32, #tpu.memory_space<vmem>>, vector<1x32xf32>
    %c17 = arith.constant 17 : index
    %c0_114 = arith.constant 0 : index
    %180 = vector.load %arg12[%c17, %c0_114] : memref<32x32xf32, #tpu.memory_space<vmem>>, vector<1x32xf32>
    tpu.vector_store %arg12[%c17, %c0_114], %179 {strides = array<i32>} : memref<32x32xf32, #tpu.memory_space<vmem>>, vector<1x32xf32>,
    %181 = arith.index_cast %177 : i32 to index
    %c0_115 = arith.constant 0 : index
    %182 = vector.load %arg11[%181, %c0_115] : memref<16x32xf32, #tpu.memory_space<vmem>>, vector<1x32xf32>
    %c17_116 = arith.constant 17 : index
    %c0_117 = arith.constant 0 : index
    %183 = vector.load %arg13[%c17_116, %c0_117] : memref<32x32xf32, #tpu.memory_space<vmem>>, vector<1x32xf32>
    tpu.vector_store %arg13[%c17_116, %c0_117], %182 {strides = array<i32>} : memref<32x32xf32, #tpu.memory_space<vmem>>, vector<1x32xf32>,
    %c8_i32_118 = arith.constant 8 : i32
    %184 = arith.addi %3, %c8_i32_118 : i32
    %c2_i32_119 = arith.constant 2 : i32
    %185 = arith.addi %184, %c2_i32_119 : i32
    %186 = arith.index_cast %185 : i32 to index
    %187 = memref.load %arg1[%186] : memref<96xi32, #tpu.memory_space<smem>>
    %188 = arith.index_cast %187 : i32 to index
    %c0_120 = arith.constant 0 : index
    %189 = vector.load %arg10[%188, %c0_120] : memref<16x32xf32, #tpu.memory_space<vmem>>, vector<1x32xf32>
    %c18 = arith.constant 18 : index
    %c0_121 = arith.constant 0 : index
    %190 = vector.load %arg12[%c18, %c0_121] : memref<32x32xf32, #tpu.memory_space<vmem>>, vector<1x32xf32>
    tpu.vector_store %arg12[%c18, %c0_121], %189 {strides = array<i32>} : memref<32x32xf32, #tpu.memory_space<vmem>>, vector<1x32xf32>,
    %191 = arith.index_cast %187 : i32 to index
    %c0_122 = arith.constant 0 : index
    %192 = vector.load %arg11[%191, %c0_122] : memref<16x32xf32, #tpu.memory_space<vmem>>, vector<1x32xf32>
    %c18_123 = arith.constant 18 : index
    %c0_124 = arith.constant 0 : index
    %193 = vector.load %arg13[%c18_123, %c0_124] : memref<32x32xf32, #tpu.memory_space<vmem>>, vector<1x32xf32>
    tpu.vector_store %arg13[%c18_123, %c0_124], %192 {strides = array<i32>} : memref<32x32xf32, #tpu.memory_space<vmem>>, vector<1x32xf32>,
    %c12_i32_125 = arith.constant 12 : i32
    %194 = arith.addi %3, %c12_i32_125 : i32
    %c2_i32_126 = arith.constant 2 : i32
    %195 = arith.addi %194, %c2_i32_126 : i32
    %196 = arith.index_cast %195 : i32 to index
    %197 = memref.load %arg1[%196] : memref<96xi32, #tpu.memory_space<smem>>
    %198 = arith.index_cast %197 : i32 to index
    %c0_127 = arith.constant 0 : index
    %199 = vector.load %arg10[%198, %c0_127] : memref<16x32xf32, #tpu.memory_space<vmem>>, vector<1x32xf32>
    %c19 = arith.constant 19 : index
    %c0_128 = arith.constant 0 : index
    %200 = vector.load %arg12[%c19, %c0_128] : memref<32x32xf32, #tpu.memory_space<vmem>>, vector<1x32xf32>
    tpu.vector_store %arg12[%c19, %c0_128], %199 {strides = array<i32>} : memref<32x32xf32, #tpu.memory_space<vmem>>, vector<1x32xf32>,
    %201 = arith.index_cast %197 : i32 to index
    %c0_129 = arith.constant 0 : index
    %202 = vector.load %arg11[%201, %c0_129] : memref<16x32xf32, #tpu.memory_space<vmem>>, vector<1x32xf32>
    %c19_130 = arith.constant 19 : index
    %c0_131 = arith.constant 0 : index
    %203 = vector.load %arg13[%c19_130, %c0_131] : memref<32x32xf32, #tpu.memory_space<vmem>>, vector<1x32xf32>
    tpu.vector_store %arg13[%c19_130, %c0_131], %202 {strides = array<i32>} : memref<32x32xf32, #tpu.memory_space<vmem>>, vector<1x32xf32>,
    %c16_i32_132 = arith.constant 16 : i32
    %204 = arith.addi %3, %c16_i32_132 : i32
    %c2_i32_133 = arith.constant 2 : i32
    %205 = arith.addi %204, %c2_i32_133 : i32
    %206 = arith.index_cast %205 : i32 to index
    %207 = memref.load %arg1[%206] : memref<96xi32, #tpu.memory_space<smem>>
    %208 = arith.index_cast %207 : i32 to index
    %c0_134 = arith.constant 0 : index
    %209 = vector.load %arg10[%208, %c0_134] : memref<16x32xf32, #tpu.memory_space<vmem>>, vector<1x32xf32>
    %c20 = arith.constant 20 : index
    %c0_135 = arith.constant 0 : index
    %210 = vector.load %arg12[%c20, %c0_135] : memref<32x32xf32, #tpu.memory_space<vmem>>, vector<1x32xf32>
    tpu.vector_store %arg12[%c20, %c0_135], %209 {strides = array<i32>} : memref<32x32xf32, #tpu.memory_space<vmem>>, vector<1x32xf32>,
    %211 = arith.index_cast %207 : i32 to index
    %c0_136 = arith.constant 0 : index
    %212 = vector.load %arg11[%211, %c0_136] : memref<16x32xf32, #tpu.memory_space<vmem>>, vector<1x32xf32>
    %c20_137 = arith.constant 20 : index
    %c0_138 = arith.constant 0 : index
    %213 = vector.load %arg13[%c20_137, %c0_138] : memref<32x32xf32, #tpu.memory_space<vmem>>, vector<1x32xf32>
    tpu.vector_store %arg13[%c20_137, %c0_138], %212 {strides = array<i32>} : memref<32x32xf32, #tpu.memory_space<vmem>>, vector<1x32xf32>,
    %c20_i32_139 = arith.constant 20 : i32
    %214 = arith.addi %3, %c20_i32_139 : i32
    %c2_i32_140 = arith.constant 2 : i32
    %215 = arith.addi %214, %c2_i32_140 : i32
    %216 = arith.index_cast %215 : i32 to index
    %217 = memref.load %arg1[%216] : memref<96xi32, #tpu.memory_space<smem>>
    %218 = arith.index_cast %217 : i32 to index
    %c0_141 = arith.constant 0 : index
    %219 = vector.load %arg10[%218, %c0_141] : memref<16x32xf32, #tpu.memory_space<vmem>>, vector<1x32xf32>
    %c21 = arith.constant 21 : index
    %c0_142 = arith.constant 0 : index
    %220 = vector.load %arg12[%c21, %c0_142] : memref<32x32xf32, #tpu.memory_space<vmem>>, vector<1x32xf32>
    tpu.vector_store %arg12[%c21, %c0_142], %219 {strides = array<i32>} : memref<32x32xf32, #tpu.memory_space<vmem>>, vector<1x32xf32>,
    %221 = arith.index_cast %217 : i32 to index
    %c0_143 = arith.constant 0 : index
    %222 = vector.load %arg11[%221, %c0_143] : memref<16x32xf32, #tpu.memory_space<vmem>>, vector<1x32xf32>
    %c21_144 = arith.constant 21 : index
    %c0_145 = arith.constant 0 : index
    %223 = vector.load %arg13[%c21_144, %c0_145] : memref<32x32xf32, #tpu.memory_space<vmem>>, vector<1x32xf32>
    tpu.vector_store %arg13[%c21_144, %c0_145], %222 {strides = array<i32>} : memref<32x32xf32, #tpu.memory_space<vmem>>, vector<1x32xf32>,
    %c24_i32_146 = arith.constant 24 : i32
    %224 = arith.addi %3, %c24_i32_146 : i32
    %c2_i32_147 = arith.constant 2 : i32
    %225 = arith.addi %224, %c2_i32_147 : i32
    %226 = arith.index_cast %225 : i32 to index
    %227 = memref.load %arg1[%226] : memref<96xi32, #tpu.memory_space<smem>>
    %228 = arith.index_cast %227 : i32 to index
    %c0_148 = arith.constant 0 : index
    %229 = vector.load %arg10[%228, %c0_148] : memref<16x32xf32, #tpu.memory_space<vmem>>, vector<1x32xf32>
    %c22 = arith.constant 22 : index
    %c0_149 = arith.constant 0 : index
    %230 = vector.load %arg12[%c22, %c0_149] : memref<32x32xf32, #tpu.memory_space<vmem>>, vector<1x32xf32>
    tpu.vector_store %arg12[%c22, %c0_149], %229 {strides = array<i32>} : memref<32x32xf32, #tpu.memory_space<vmem>>, vector<1x32xf32>,
    %231 = arith.index_cast %227 : i32 to index
    %c0_150 = arith.constant 0 : index
    %232 = vector.load %arg11[%231, %c0_150] : memref<16x32xf32, #tpu.memory_space<vmem>>, vector<1x32xf32>
    %c22_151 = arith.constant 22 : index
    %c0_152 = arith.constant 0 : index
    %233 = vector.load %arg13[%c22_151, %c0_152] : memref<32x32xf32, #tpu.memory_space<vmem>>, vector<1x32xf32>
    tpu.vector_store %arg13[%c22_151, %c0_152], %232 {strides = array<i32>} : memref<32x32xf32, #tpu.memory_space<vmem>>, vector<1x32xf32>,
    %c28_i32_153 = arith.constant 28 : i32
    %234 = arith.addi %3, %c28_i32_153 : i32
    %c2_i32_154 = arith.constant 2 : i32
    %235 = arith.addi %234, %c2_i32_154 : i32
    %236 = arith.index_cast %235 : i32 to index
    %237 = memref.load %arg1[%236] : memref<96xi32, #tpu.memory_space<smem>>
    %238 = arith.index_cast %237 : i32 to index
    %c0_155 = arith.constant 0 : index
    %239 = vector.load %arg10[%238, %c0_155] : memref<16x32xf32, #tpu.memory_space<vmem>>, vector<1x32xf32>
    %c23 = arith.constant 23 : index
    %c0_156 = arith.constant 0 : index
    %240 = vector.load %arg12[%c23, %c0_156] : memref<32x32xf32, #tpu.memory_space<vmem>>, vector<1x32xf32>
    tpu.vector_store %arg12[%c23, %c0_156], %239 {strides = array<i32>} : memref<32x32xf32, #tpu.memory_space<vmem>>, vector<1x32xf32>,
    %241 = arith.index_cast %237 : i32 to index
    %c0_157 = arith.constant 0 : index
    %242 = vector.load %arg11[%241, %c0_157] : memref<16x32xf32, #tpu.memory_space<vmem>>, vector<1x32xf32>
    %c23_158 = arith.constant 23 : index
    %c0_159 = arith.constant 0 : index
    %243 = vector.load %arg13[%c23_158, %c0_159] : memref<32x32xf32, #tpu.memory_space<vmem>>, vector<1x32xf32>
    tpu.vector_store %arg13[%c23_158, %c0_159], %242 {strides = array<i32>} : memref<32x32xf32, #tpu.memory_space<vmem>>, vector<1x32xf32>,
    %c0_i32_160 = arith.constant 0 : i32
    %244 = arith.addi %3, %c0_i32_160 : i32
    %c3_i32 = arith.constant 3 : i32
    %245 = arith.addi %244, %c3_i32 : i32
    %246 = arith.index_cast %245 : i32 to index
    %247 = memref.load %arg1[%246] : memref<96xi32, #tpu.memory_space<smem>>
    %248 = arith.index_cast %247 : i32 to index
    %c0_161 = arith.constant 0 : index
    %249 = vector.load %arg10[%248, %c0_161] : memref<16x32xf32, #tpu.memory_space<vmem>>, vector<1x32xf32>
    %c24 = arith.constant 24 : index
    %c0_162 = arith.constant 0 : index
    %250 = vector.load %arg12[%c24, %c0_162] : memref<32x32xf32, #tpu.memory_space<vmem>>, vector<1x32xf32>
    tpu.vector_store %arg12[%c24, %c0_162], %249 {strides = array<i32>} : memref<32x32xf32, #tpu.memory_space<vmem>>, vector<1x32xf32>,
    %251 = arith.index_cast %247 : i32 to index
    %c0_163 = arith.constant 0 : index
    %252 = vector.load %arg11[%251, %c0_163] : memref<16x32xf32, #tpu.memory_space<vmem>>, vector<1x32xf32>
    %c24_164 = arith.constant 24 : index
    %c0_165 = arith.constant 0 : index
    %253 = vector.load %arg13[%c24_164, %c0_165] : memref<32x32xf32, #tpu.memory_space<vmem>>, vector<1x32xf32>
    tpu.vector_store %arg13[%c24_164, %c0_165], %252 {strides = array<i32>} : memref<32x32xf32, #tpu.memory_space<vmem>>, vector<1x32xf32>,
    %c4_i32_166 = arith.constant 4 : i32
    %254 = arith.addi %3, %c4_i32_166 : i32
    %c3_i32_167 = arith.constant 3 : i32
    %255 = arith.addi %254, %c3_i32_167 : i32
    %256 = arith.index_cast %255 : i32 to index
    %257 = memref.load %arg1[%256] : memref<96xi32, #tpu.memory_space<smem>>
    %258 = arith.index_cast %257 : i32 to index
    %c0_168 = arith.constant 0 : index
    %259 = vector.load %arg10[%258, %c0_168] : memref<16x32xf32, #tpu.memory_space<vmem>>, vector<1x32xf32>
    %c25 = arith.constant 25 : index
    %c0_169 = arith.constant 0 : index
    %260 = vector.load %arg12[%c25, %c0_169] : memref<32x32xf32, #tpu.memory_space<vmem>>, vector<1x32xf32>
    tpu.vector_store %arg12[%c25, %c0_169], %259 {strides = array<i32>} : memref<32x32xf32, #tpu.memory_space<vmem>>, vector<1x32xf32>,
    %261 = arith.index_cast %257 : i32 to index
    %c0_170 = arith.constant 0 : index
    %262 = vector.load %arg11[%261, %c0_170] : memref<16x32xf32, #tpu.memory_space<vmem>>, vector<1x32xf32>
    %c25_171 = arith.constant 25 : index
    %c0_172 = arith.constant 0 : index
    %263 = vector.load %arg13[%c25_171, %c0_172] : memref<32x32xf32, #tpu.memory_space<vmem>>, vector<1x32xf32>
    tpu.vector_store %arg13[%c25_171, %c0_172], %262 {strides = array<i32>} : memref<32x32xf32, #tpu.memory_space<vmem>>, vector<1x32xf32>,
    %c8_i32_173 = arith.constant 8 : i32
    %264 = arith.addi %3, %c8_i32_173 : i32
    %c3_i32_174 = arith.constant 3 : i32
    %265 = arith.addi %264, %c3_i32_174 : i32
    %266 = arith.index_cast %265 : i32 to index
    %267 = memref.load %arg1[%266] : memref<96xi32, #tpu.memory_space<smem>>
    %268 = arith.index_cast %267 : i32 to index
    %c0_175 = arith.constant 0 : index
    %269 = vector.load %arg10[%268, %c0_175] : memref<16x32xf32, #tpu.memory_space<vmem>>, vector<1x32xf32>
    %c26 = arith.constant 26 : index
    %c0_176 = arith.constant 0 : index
    %270 = vector.load %arg12[%c26, %c0_176] : memref<32x32xf32, #tpu.memory_space<vmem>>, vector<1x32xf32>
    tpu.vector_store %arg12[%c26, %c0_176], %269 {strides = array<i32>} : memref<32x32xf32, #tpu.memory_space<vmem>>, vector<1x32xf32>,
    %271 = arith.index_cast %267 : i32 to index
    %c0_177 = arith.constant 0 : index
    %272 = vector.load %arg11[%271, %c0_177] : memref<16x32xf32, #tpu.memory_space<vmem>>, vector<1x32xf32>
    %c26_178 = arith.constant 26 : index
    %c0_179 = arith.constant 0 : index
    %273 = vector.load %arg13[%c26_178, %c0_179] : memref<32x32xf32, #tpu.memory_space<vmem>>, vector<1x32xf32>
    tpu.vector_store %arg13[%c26_178, %c0_179], %272 {strides = array<i32>} : memref<32x32xf32, #tpu.memory_space<vmem>>, vector<1x32xf32>,
    %c12_i32_180 = arith.constant 12 : i32
    %274 = arith.addi %3, %c12_i32_180 : i32
    %c3_i32_181 = arith.constant 3 : i32
    %275 = arith.addi %274, %c3_i32_181 : i32
    %276 = arith.index_cast %275 : i32 to index
    %277 = memref.load %arg1[%276] : memref<96xi32, #tpu.memory_space<smem>>
    %278 = arith.index_cast %277 : i32 to index
    %c0_182 = arith.constant 0 : index
    %279 = vector.load %arg10[%278, %c0_182] : memref<16x32xf32, #tpu.memory_space<vmem>>, vector<1x32xf32>
    %c27 = arith.constant 27 : index
    %c0_183 = arith.constant 0 : index
    %280 = vector.load %arg12[%c27, %c0_183] : memref<32x32xf32, #tpu.memory_space<vmem>>, vector<1x32xf32>
    tpu.vector_store %arg12[%c27, %c0_183], %279 {strides = array<i32>} : memref<32x32xf32, #tpu.memory_space<vmem>>, vector<1x32xf32>,
    %281 = arith.index_cast %277 : i32 to index
    %c0_184 = arith.constant 0 : index
    %282 = vector.load %arg11[%281, %c0_184] : memref<16x32xf32, #tpu.memory_space<vmem>>, vector<1x32xf32>
    %c27_185 = arith.constant 27 : index
    %c0_186 = arith.constant 0 : index
    %283 = vector.load %arg13[%c27_185, %c0_186] : memref<32x32xf32, #tpu.memory_space<vmem>>, vector<1x32xf32>
    tpu.vector_store %arg13[%c27_185, %c0_186], %282 {strides = array<i32>} : memref<32x32xf32, #tpu.memory_space<vmem>>, vector<1x32xf32>,
    %c16_i32_187 = arith.constant 16 : i32
    %284 = arith.addi %3, %c16_i32_187 : i32
    %c3_i32_188 = arith.constant 3 : i32
    %285 = arith.addi %284, %c3_i32_188 : i32
    %286 = arith.index_cast %285 : i32 to index
    %287 = memref.load %arg1[%286] : memref<96xi32, #tpu.memory_space<smem>>
    %288 = arith.index_cast %287 : i32 to index
    %c0_189 = arith.constant 0 : index
    %289 = vector.load %arg10[%288, %c0_189] : memref<16x32xf32, #tpu.memory_space<vmem>>, vector<1x32xf32>
    %c28 = arith.constant 28 : index
    %c0_190 = arith.constant 0 : index
    %290 = vector.load %arg12[%c28, %c0_190] : memref<32x32xf32, #tpu.memory_space<vmem>>, vector<1x32xf32>
    tpu.vector_store %arg12[%c28, %c0_190], %289 {strides = array<i32>} : memref<32x32xf32, #tpu.memory_space<vmem>>, vector<1x32xf32>,
    %291 = arith.index_cast %287 : i32 to index
    %c0_191 = arith.constant 0 : index
    %292 = vector.load %arg11[%291, %c0_191] : memref<16x32xf32, #tpu.memory_space<vmem>>, vector<1x32xf32>
    %c28_192 = arith.constant 28 : index
    %c0_193 = arith.constant 0 : index
    %293 = vector.load %arg13[%c28_192, %c0_193] : memref<32x32xf32, #tpu.memory_space<vmem>>, vector<1x32xf32>
    tpu.vector_store %arg13[%c28_192, %c0_193], %292 {strides = array<i32>} : memref<32x32xf32, #tpu.memory_space<vmem>>, vector<1x32xf32>,
    %c20_i32_194 = arith.constant 20 : i32
    %294 = arith.addi %3, %c20_i32_194 : i32
    %c3_i32_195 = arith.constant 3 : i32
    %295 = arith.addi %294, %c3_i32_195 : i32
    %296 = arith.index_cast %295 : i32 to index
    %297 = memref.load %arg1[%296] : memref<96xi32, #tpu.memory_space<smem>>
    %298 = arith.index_cast %297 : i32 to index
    %c0_196 = arith.constant 0 : index
    %299 = vector.load %arg10[%298, %c0_196] : memref<16x32xf32, #tpu.memory_space<vmem>>, vector<1x32xf32>
    %c29 = arith.constant 29 : index
    %c0_197 = arith.constant 0 : index
    %300 = vector.load %arg12[%c29, %c0_197] : memref<32x32xf32, #tpu.memory_space<vmem>>, vector<1x32xf32>
    tpu.vector_store %arg12[%c29, %c0_197], %299 {strides = array<i32>} : memref<32x32xf32, #tpu.memory_space<vmem>>, vector<1x32xf32>,
    %301 = arith.index_cast %297 : i32 to index
    %c0_198 = arith.constant 0 : index
    %302 = vector.load %arg11[%301, %c0_198] : memref<16x32xf32, #tpu.memory_space<vmem>>, vector<1x32xf32>
    %c29_199 = arith.constant 29 : index
    %c0_200 = arith.constant 0 : index
    %303 = vector.load %arg13[%c29_199, %c0_200] : memref<32x32xf32, #tpu.memory_space<vmem>>, vector<1x32xf32>
    tpu.vector_store %arg13[%c29_199, %c0_200], %302 {strides = array<i32>} : memref<32x32xf32, #tpu.memory_space<vmem>>, vector<1x32xf32>,
    %c24_i32_201 = arith.constant 24 : i32
    %304 = arith.addi %3, %c24_i32_201 : i32
    %c3_i32_202 = arith.constant 3 : i32
    %305 = arith.addi %304, %c3_i32_202 : i32
    %306 = arith.index_cast %305 : i32 to index
    %307 = memref.load %arg1[%306] : memref<96xi32, #tpu.memory_space<smem>>
    %308 = arith.index_cast %307 : i32 to index
    %c0_203 = arith.constant 0 : index
    %309 = vector.load %arg10[%308, %c0_203] : memref<16x32xf32, #tpu.memory_space<vmem>>, vector<1x32xf32>
    %c30 = arith.constant 30 : index
    %c0_204 = arith.constant 0 : index
    %310 = vector.load %arg12[%c30, %c0_204] : memref<32x32xf32, #tpu.memory_space<vmem>>, vector<1x32xf32>
    tpu.vector_store %arg12[%c30, %c0_204], %309 {strides = array<i32>} : memref<32x32xf32, #tpu.memory_space<vmem>>, vector<1x32xf32>,
    %311 = arith.index_cast %307 : i32 to index
    %c0_205 = arith.constant 0 : index
    %312 = vector.load %arg11[%311, %c0_205] : memref<16x32xf32, #tpu.memory_space<vmem>>, vector<1x32xf32>
    %c30_206 = arith.constant 30 : index
    %c0_207 = arith.constant 0 : index
    %313 = vector.load %arg13[%c30_206, %c0_207] : memref<32x32xf32, #tpu.memory_space<vmem>>, vector<1x32xf32>
    tpu.vector_store %arg13[%c30_206, %c0_207], %312 {strides = array<i32>} : memref<32x32xf32, #tpu.memory_space<vmem>>, vector<1x32xf32>,
    %c28_i32_208 = arith.constant 28 : i32
    %314 = arith.addi %3, %c28_i32_208 : i32
    %c3_i32_209 = arith.constant 3 : i32
    %315 = arith.addi %314, %c3_i32_209 : i32
    %316 = arith.index_cast %315 : i32 to index
    %317 = memref.load %arg1[%316] : memref<96xi32, #tpu.memory_space<smem>>
    %318 = arith.index_cast %317 : i32 to index
    %c0_210 = arith.constant 0 : index
    %319 = vector.load %arg10[%318, %c0_210] : memref<16x32xf32, #tpu.memory_space<vmem>>, vector<1x32xf32>
    %c31 = arith.constant 31 : index
    %c0_211 = arith.constant 0 : index
    %320 = vector.load %arg12[%c31, %c0_211] : memref<32x32xf32, #tpu.memory_space<vmem>>, vector<1x32xf32>
    tpu.vector_store %arg12[%c31, %c0_211], %319 {strides = array<i32>} : memref<32x32xf32, #tpu.memory_space<vmem>>, vector<1x32xf32>,
    %321 = arith.index_cast %317 : i32 to index
    %c0_212 = arith.constant 0 : index
    %322 = vector.load %arg11[%321, %c0_212] : memref<16x32xf32, #tpu.memory_space<vmem>>, vector<1x32xf32>
    %c31_213 = arith.constant 31 : index
    %c0_214 = arith.constant 0 : index
    %323 = vector.load %arg13[%c31_213, %c0_214] : memref<32x32xf32, #tpu.memory_space<vmem>>, vector<1x32xf32>
    tpu.vector_store %arg13[%c31_213, %c0_214], %322 {strides = array<i32>} : memref<32x32xf32, #tpu.memory_space<vmem>>, vector<1x32xf32>,
    %c0_215 = arith.constant 0 : index
    %c0_216 = arith.constant 0 : index
    %c0_217 = arith.constant 0 : index
    %324 = vector.load %arg3[%c0_215, %c0_216, %c0_217] : memref<1x8x32xf32, #tpu.memory_space<vmem>>, vector<1x8x32xf32>
    %325 = vector.shape_cast %324 : vector<1x8x32xf32> to vector<8x32xf32>
    %c0_218 = arith.constant 0 : index
    %c0_219 = arith.constant 0 : index
    %326 = vector.load %arg12[%c0_218, %c0_219] : memref<32x32xf32, #tpu.memory_space<vmem>>, vector<32x32xf32>
    %c0_220 = arith.constant 0 : index
    %c0_221 = arith.constant 0 : index
    %327 = vector.load %arg13[%c0_220, %c0_221] : memref<32x32xf32, #tpu.memory_space<vmem>>, vector<32x32xf32>
    %cst = arith.constant 0.000000e+00 : f32
    %328 = vector.broadcast %cst : f32 to vector<8x32xf32>
    %329 = vector.extract_strided_slice %327 {offsets = [0, 0], sizes = [8, 32], strides = [1, 1]} : vector<32x32xf32> to vector<8x32xf32>
    %330 = arith.addf %328, %329 : vector<8x32xf32>
    %331 = vector.extract_strided_slice %327 {offsets = [8, 0], sizes = [8, 32], strides = [1, 1]} : vector<32x32xf32> to vector<8x32xf32>
    %332 = arith.addf %330, %331 : vector<8x32xf32>
    %333 = vector.extract_strided_slice %327 {offsets = [16, 0], sizes = [8, 32], strides = [1, 1]} : vector<32x32xf32> to vector<8x32xf32>
    %334 = arith.addf %332, %333 : vector<8x32xf32>
    %335 = vector.extract_strided_slice %327 {offsets = [24, 0], sizes = [8, 32], strides = [1, 1]} : vector<32x32xf32> to vector<8x32xf32>
    %336 = arith.addf %334, %335 : vector<8x32xf32>
    %337 = tpu.concatenate %325, %336 in 1 : vector<8x32xf32>, vector<8x32xf32> -> vector<8x64xf32>
    %c0_222 = arith.constant 0 : index
    %c0_223 = arith.constant 0 : index
    %338 = vector.load %arg4[%c0_222, %c0_223] : memref<64x128xf32, #tpu.memory_space<vmem>>, vector<64x128xf32>
    %cst_224 = arith.constant dense<0.000000e+00> : vector<8x128xf32>
    %339 = tpu.matmul %337, %338, %cst_224 {dimension_numbers = #tpu.dot_dimension_numbers<[1], [0], [0], [1], [0, 0, 1, 1], [], []>} : vector<8x64xf32>, vector<64x128xf32>, vector<8x128xf32> -> vector<8x128xf32>
    %c0_225 = arith.constant 0 : index
    %c0_226 = arith.constant 0 : index
    %340 = vector.load %arg5[%c0_225, %c0_226] : memref<1x128xf32, #tpu.memory_space<vmem>>, vector<1x128xf32>
    %341 = vector.broadcast %340 : vector<1x128xf32> to vector<8x128xf32>
    %342 = arith.addf %339, %341 : vector<8x128xf32>
    %343 = vector.extract_strided_slice %342 {offsets = [0, 0], sizes = [8, 32], strides = [1, 1]} : vector<8x128xf32> to vector<8x32xf32>
    %344 = arith.negf %343 : vector<8x32xf32>
    %345 = math.exp %344 : vector<8x32xf32>
    %cst_227 = arith.constant 1.000000e+00 : f32
    %346 = vector.broadcast %cst_227 : f32 to vector<8x32xf32>
    %347 = arith.addf %346, %345 : vector<8x32xf32>
    %348 = arith.divf %346, %347 : vector<8x32xf32>
    %349 = vector.extract_strided_slice %342 {offsets = [0, 32], sizes = [8, 32], strides = [1, 1]} : vector<8x128xf32> to vector<8x32xf32>
    %350 = arith.negf %349 : vector<8x32xf32>
    %351 = math.exp %350 : vector<8x32xf32>
    %cst_228 = arith.constant 1.000000e+00 : f32
    %352 = vector.broadcast %cst_228 : f32 to vector<8x32xf32>
    %353 = arith.addf %352, %351 : vector<8x32xf32>
    %354 = arith.divf %352, %353 : vector<8x32xf32>
    %355 = vector.extract_strided_slice %342 {offsets = [0, 64], sizes = [8, 32], strides = [1, 1]} : vector<8x128xf32> to vector<8x32xf32>
    %356 = math.tanh %355 : vector<8x32xf32>
    %357 = vector.extract_strided_slice %342 {offsets = [0, 96], sizes = [8, 32], strides = [1, 1]} : vector<8x128xf32> to vector<8x32xf32>
    %c0_229 = arith.constant 0 : index
    %c0_230 = arith.constant 0 : index
    %358 = vector.load %arg6[%c0_229, %c0_230] : memref<32x32xf32, #tpu.memory_space<vmem>>, vector<32x32xf32>
    %cst_231 = arith.constant dense<0.000000e+00> : vector<32x32xf32>
    %359 = tpu.matmul %327, %358, %cst_231 {dimension_numbers = #tpu.dot_dimension_numbers<[1], [0], [0], [1], [0, 0, 1, 1], [], []>} : vector<32x32xf32>, vector<32x32xf32>, vector<32x32xf32> -> vector<32x32xf32>
    %c0_232 = arith.constant 0 : index
    %c0_233 = arith.constant 0 : index
    %360 = vector.load %arg7[%c0_232, %c0_233] : memref<1x32xf32, #tpu.memory_space<vmem>>, vector<1x32xf32>
    %361 = vector.broadcast %360 : vector<1x32xf32> to vector<32x32xf32>
    %362 = arith.addf %359, %361 : vector<32x32xf32>
    %cst_234 = arith.constant 0.000000e+00 : f32
    %363 = vector.broadcast %cst_234 : f32 to vector<8x32xf32>
    %364 = vector.extract_strided_slice %362 {offsets = [0, 0], sizes = [8, 32], strides = [1, 1]} : vector<32x32xf32> to vector<8x32xf32>
    %365 = arith.addf %364, %357 : vector<8x32xf32>
    %366 = arith.negf %365 : vector<8x32xf32>
    %367 = math.exp %366 : vector<8x32xf32>
    %cst_235 = arith.constant 1.000000e+00 : f32
    %368 = vector.broadcast %cst_235 : f32 to vector<8x32xf32>
    %369 = arith.addf %368, %367 : vector<8x32xf32>
    %370 = arith.divf %368, %369 : vector<8x32xf32>
    %371 = vector.extract_strided_slice %326 {offsets = [0, 0], sizes = [8, 32], strides = [1, 1]} : vector<32x32xf32> to vector<8x32xf32>
    %372 = arith.mulf %370, %371 : vector<8x32xf32>
    %373 = arith.addf %363, %372 : vector<8x32xf32>
    %374 = vector.extract_strided_slice %362 {offsets = [8, 0], sizes = [8, 32], strides = [1, 1]} : vector<32x32xf32> to vector<8x32xf32>
    %375 = arith.addf %374, %357 : vector<8x32xf32>
    %376 = arith.negf %375 : vector<8x32xf32>
    %377 = math.exp %376 : vector<8x32xf32>
    %cst_236 = arith.constant 1.000000e+00 : f32
    %378 = vector.broadcast %cst_236 : f32 to vector<8x32xf32>
    %379 = arith.addf %378, %377 : vector<8x32xf32>
    %380 = arith.divf %378, %379 : vector<8x32xf32>
    %381 = vector.extract_strided_slice %326 {offsets = [8, 0], sizes = [8, 32], strides = [1, 1]} : vector<32x32xf32> to vector<8x32xf32>
    %382 = arith.mulf %380, %381 : vector<8x32xf32>
    %383 = arith.addf %373, %382 : vector<8x32xf32>
    %384 = vector.extract_strided_slice %362 {offsets = [16, 0], sizes = [8, 32], strides = [1, 1]} : vector<32x32xf32> to vector<8x32xf32>
    %385 = arith.addf %384, %357 : vector<8x32xf32>
    %386 = arith.negf %385 : vector<8x32xf32>
    %387 = math.exp %386 : vector<8x32xf32>
    %cst_237 = arith.constant 1.000000e+00 : f32
    %388 = vector.broadcast %cst_237 : f32 to vector<8x32xf32>
    %389 = arith.addf %388, %387 : vector<8x32xf32>
    %390 = arith.divf %388, %389 : vector<8x32xf32>
    %391 = vector.extract_strided_slice %326 {offsets = [16, 0], sizes = [8, 32], strides = [1, 1]} : vector<32x32xf32> to vector<8x32xf32>
    %392 = arith.mulf %390, %391 : vector<8x32xf32>
    %393 = arith.addf %383, %392 : vector<8x32xf32>
    %394 = vector.extract_strided_slice %362 {offsets = [24, 0], sizes = [8, 32], strides = [1, 1]} : vector<32x32xf32> to vector<8x32xf32>
    %395 = arith.addf %394, %357 : vector<8x32xf32>
    %396 = arith.negf %395 : vector<8x32xf32>
    %397 = math.exp %396 : vector<8x32xf32>
    %cst_238 = arith.constant 1.000000e+00 : f32
    %398 = vector.broadcast %cst_238 : f32 to vector<8x32xf32>
    %399 = arith.addf %398, %397 : vector<8x32xf32>
    %400 = arith.divf %398, %399 : vector<8x32xf32>
    %401 = vector.extract_strided_slice %326 {offsets = [24, 0], sizes = [8, 32], strides = [1, 1]} : vector<32x32xf32> to vector<8x32xf32>
    %402 = arith.mulf %400, %401 : vector<8x32xf32>
    %403 = arith.addf %393, %402 : vector<8x32xf32>
    %404 = arith.mulf %348, %356 : vector<8x32xf32>
    %405 = arith.addf %404, %403 : vector<8x32xf32>
    %406 = math.tanh %405 : vector<8x32xf32>
    %407 = arith.mulf %354, %406 : vector<8x32xf32>
    %c8_i32_239 = arith.constant 8 : i32
    %408 = arith.muli %arg0, %c8_i32_239 : i32
    %c0_i32_240 = arith.constant 0 : i32
    %409 = arith.addi %408, %c0_i32_240 : i32
    %410 = arith.index_cast %409 : i32 to index
    %411 = memref.load %arg2[%410] : memref<24xi32, #tpu.memory_space<smem>>
    %412 = vector.extract_strided_slice %405 {offsets = [0, 0], sizes = [1, 32], strides = [1, 1]} : vector<8x32xf32> to vector<1x32xf32>
    %413 = arith.index_cast %411 : i32 to index
    %c0_241 = arith.constant 0 : index
    %414 = vector.load %arg10[%413, %c0_241] : memref<16x32xf32, #tpu.memory_space<vmem>>, vector<1x32xf32>
    tpu.vector_store %arg10[%413, %c0_241], %412 {strides = array<i32>} : memref<16x32xf32, #tpu.memory_space<vmem>>, vector<1x32xf32>,
    %415 = vector.extract_strided_slice %407 {offsets = [0, 0], sizes = [1, 32], strides = [1, 1]} : vector<8x32xf32> to vector<1x32xf32>
    %416 = arith.index_cast %411 : i32 to index
    %c0_242 = arith.constant 0 : index
    %417 = vector.load %arg11[%416, %c0_242] : memref<16x32xf32, #tpu.memory_space<vmem>>, vector<1x32xf32>
    tpu.vector_store %arg11[%416, %c0_242], %415 {strides = array<i32>} : memref<16x32xf32, #tpu.memory_space<vmem>>, vector<1x32xf32>,
    %c8_i32_243 = arith.constant 8 : i32
    %418 = arith.muli %arg0, %c8_i32_243 : i32
    %c1_i32_244 = arith.constant 1 : i32
    %419 = arith.addi %418, %c1_i32_244 : i32
    %420 = arith.index_cast %419 : i32 to index
    %421 = memref.load %arg2[%420] : memref<24xi32, #tpu.memory_space<smem>>
    %422 = vector.extract_strided_slice %405 {offsets = [1, 0], sizes = [1, 32], strides = [1, 1]} : vector<8x32xf32> to vector<1x32xf32>
    %423 = arith.index_cast %421 : i32 to index
    %c0_245 = arith.constant 0 : index
    %424 = vector.load %arg10[%423, %c0_245] : memref<16x32xf32, #tpu.memory_space<vmem>>, vector<1x32xf32>
    tpu.vector_store %arg10[%423, %c0_245], %422 {strides = array<i32>} : memref<16x32xf32, #tpu.memory_space<vmem>>, vector<1x32xf32>,
    %425 = vector.extract_strided_slice %407 {offsets = [1, 0], sizes = [1, 32], strides = [1, 1]} : vector<8x32xf32> to vector<1x32xf32>
    %426 = arith.index_cast %421 : i32 to index
    %c0_246 = arith.constant 0 : index
    %427 = vector.load %arg11[%426, %c0_246] : memref<16x32xf32, #tpu.memory_space<vmem>>, vector<1x32xf32>
    tpu.vector_store %arg11[%426, %c0_246], %425 {strides = array<i32>} : memref<16x32xf32, #tpu.memory_space<vmem>>, vector<1x32xf32>,
    %c8_i32_247 = arith.constant 8 : i32
    %428 = arith.muli %arg0, %c8_i32_247 : i32
    %c2_i32_248 = arith.constant 2 : i32
    %429 = arith.addi %428, %c2_i32_248 : i32
    %430 = arith.index_cast %429 : i32 to index
    %431 = memref.load %arg2[%430] : memref<24xi32, #tpu.memory_space<smem>>
    %432 = vector.extract_strided_slice %405 {offsets = [2, 0], sizes = [1, 32], strides = [1, 1]} : vector<8x32xf32> to vector<1x32xf32>
    %433 = arith.index_cast %431 : i32 to index
    %c0_249 = arith.constant 0 : index
    %434 = vector.load %arg10[%433, %c0_249] : memref<16x32xf32, #tpu.memory_space<vmem>>, vector<1x32xf32>
    tpu.vector_store %arg10[%433, %c0_249], %432 {strides = array<i32>} : memref<16x32xf32, #tpu.memory_space<vmem>>, vector<1x32xf32>,
    %435 = vector.extract_strided_slice %407 {offsets = [2, 0], sizes = [1, 32], strides = [1, 1]} : vector<8x32xf32> to vector<1x32xf32>
    %436 = arith.index_cast %431 : i32 to index
    %c0_250 = arith.constant 0 : index
    %437 = vector.load %arg11[%436, %c0_250] : memref<16x32xf32, #tpu.memory_space<vmem>>, vector<1x32xf32>
    tpu.vector_store %arg11[%436, %c0_250], %435 {strides = array<i32>} : memref<16x32xf32, #tpu.memory_space<vmem>>, vector<1x32xf32>,
    %c8_i32_251 = arith.constant 8 : i32
    %438 = arith.muli %arg0, %c8_i32_251 : i32
    %c3_i32_252 = arith.constant 3 : i32
    %439 = arith.addi %438, %c3_i32_252 : i32
    %440 = arith.index_cast %439 : i32 to index
    %441 = memref.load %arg2[%440] : memref<24xi32, #tpu.memory_space<smem>>
    %442 = vector.extract_strided_slice %405 {offsets = [3, 0], sizes = [1, 32], strides = [1, 1]} : vector<8x32xf32> to vector<1x32xf32>
    %443 = arith.index_cast %441 : i32 to index
    %c0_253 = arith.constant 0 : index
    %444 = vector.load %arg10[%443, %c0_253] : memref<16x32xf32, #tpu.memory_space<vmem>>, vector<1x32xf32>
    tpu.vector_store %arg10[%443, %c0_253], %442 {strides = array<i32>} : memref<16x32xf32, #tpu.memory_space<vmem>>, vector<1x32xf32>,
    %445 = vector.extract_strided_slice %407 {offsets = [3, 0], sizes = [1, 32], strides = [1, 1]} : vector<8x32xf32> to vector<1x32xf32>
    %446 = arith.index_cast %441 : i32 to index
    %c0_254 = arith.constant 0 : index
    %447 = vector.load %arg11[%446, %c0_254] : memref<16x32xf32, #tpu.memory_space<vmem>>, vector<1x32xf32>
    tpu.vector_store %arg11[%446, %c0_254], %445 {strides = array<i32>} : memref<16x32xf32, #tpu.memory_space<vmem>>, vector<1x32xf32>,
    %c8_i32_255 = arith.constant 8 : i32
    %448 = arith.muli %arg0, %c8_i32_255 : i32
    %c4_i32_256 = arith.constant 4 : i32
    %449 = arith.addi %448, %c4_i32_256 : i32
    %450 = arith.index_cast %449 : i32 to index
    %451 = memref.load %arg2[%450] : memref<24xi32, #tpu.memory_space<smem>>
    %452 = vector.extract_strided_slice %405 {offsets = [4, 0], sizes = [1, 32], strides = [1, 1]} : vector<8x32xf32> to vector<1x32xf32>
    %453 = arith.index_cast %451 : i32 to index
    %c0_257 = arith.constant 0 : index
    %454 = vector.load %arg10[%453, %c0_257] : memref<16x32xf32, #tpu.memory_space<vmem>>, vector<1x32xf32>
    tpu.vector_store %arg10[%453, %c0_257], %452 {strides = array<i32>} : memref<16x32xf32, #tpu.memory_space<vmem>>, vector<1x32xf32>,
    %455 = vector.extract_strided_slice %407 {offsets = [4, 0], sizes = [1, 32], strides = [1, 1]} : vector<8x32xf32> to vector<1x32xf32>
    %456 = arith.index_cast %451 : i32 to index
    %c0_258 = arith.constant 0 : index
    %457 = vector.load %arg11[%456, %c0_258] : memref<16x32xf32, #tpu.memory_space<vmem>>, vector<1x32xf32>
    tpu.vector_store %arg11[%456, %c0_258], %455 {strides = array<i32>} : memref<16x32xf32, #tpu.memory_space<vmem>>, vector<1x32xf32>,
    %c8_i32_259 = arith.constant 8 : i32
    %458 = arith.muli %arg0, %c8_i32_259 : i32
    %c5_i32 = arith.constant 5 : i32
    %459 = arith.addi %458, %c5_i32 : i32
    %460 = arith.index_cast %459 : i32 to index
    %461 = memref.load %arg2[%460] : memref<24xi32, #tpu.memory_space<smem>>
    %462 = vector.extract_strided_slice %405 {offsets = [5, 0], sizes = [1, 32], strides = [1, 1]} : vector<8x32xf32> to vector<1x32xf32>
    %463 = arith.index_cast %461 : i32 to index
    %c0_260 = arith.constant 0 : index
    %464 = vector.load %arg10[%463, %c0_260] : memref<16x32xf32, #tpu.memory_space<vmem>>, vector<1x32xf32>
    tpu.vector_store %arg10[%463, %c0_260], %462 {strides = array<i32>} : memref<16x32xf32, #tpu.memory_space<vmem>>, vector<1x32xf32>,
    %465 = vector.extract_strided_slice %407 {offsets = [5, 0], sizes = [1, 32], strides = [1, 1]} : vector<8x32xf32> to vector<1x32xf32>
    %466 = arith.index_cast %461 : i32 to index
    %c0_261 = arith.constant 0 : index
    %467 = vector.load %arg11[%466, %c0_261] : memref<16x32xf32, #tpu.memory_space<vmem>>, vector<1x32xf32>
    tpu.vector_store %arg11[%466, %c0_261], %465 {strides = array<i32>} : memref<16x32xf32, #tpu.memory_space<vmem>>, vector<1x32xf32>,
    %c8_i32_262 = arith.constant 8 : i32
    %468 = arith.muli %arg0, %c8_i32_262 : i32
    %c6_i32 = arith.constant 6 : i32
    %469 = arith.addi %468, %c6_i32 : i32
    %470 = arith.index_cast %469 : i32 to index
    %471 = memref.load %arg2[%470] : memref<24xi32, #tpu.memory_space<smem>>
    %472 = vector.extract_strided_slice %405 {offsets = [6, 0], sizes = [1, 32], strides = [1, 1]} : vector<8x32xf32> to vector<1x32xf32>
    %473 = arith.index_cast %471 : i32 to index
    %c0_263 = arith.constant 0 : index
    %474 = vector.load %arg10[%473, %c0_263] : memref<16x32xf32, #tpu.memory_space<vmem>>, vector<1x32xf32>
    tpu.vector_store %arg10[%473, %c0_263], %472 {strides = array<i32>} : memref<16x32xf32, #tpu.memory_space<vmem>>, vector<1x32xf32>,
    %475 = vector.extract_strided_slice %407 {offsets = [6, 0], sizes = [1, 32], strides = [1, 1]} : vector<8x32xf32> to vector<1x32xf32>
    %476 = arith.index_cast %471 : i32 to index
    %c0_264 = arith.constant 0 : index
    %477 = vector.load %arg11[%476, %c0_264] : memref<16x32xf32, #tpu.memory_space<vmem>>, vector<1x32xf32>
    tpu.vector_store %arg11[%476, %c0_264], %475 {strides = array<i32>} : memref<16x32xf32, #tpu.memory_space<vmem>>, vector<1x32xf32>,
    %c8_i32_265 = arith.constant 8 : i32
    %478 = arith.muli %arg0, %c8_i32_265 : i32
    %c7_i32 = arith.constant 7 : i32
    %479 = arith.addi %478, %c7_i32 : i32
    %480 = arith.index_cast %479 : i32 to index
    %481 = memref.load %arg2[%480] : memref<24xi32, #tpu.memory_space<smem>>
    %482 = vector.extract_strided_slice %405 {offsets = [7, 0], sizes = [1, 32], strides = [1, 1]} : vector<8x32xf32> to vector<1x32xf32>
    %483 = arith.index_cast %481 : i32 to index
    %c0_266 = arith.constant 0 : index
    %484 = vector.load %arg10[%483, %c0_266] : memref<16x32xf32, #tpu.memory_space<vmem>>, vector<1x32xf32>
    tpu.vector_store %arg10[%483, %c0_266], %482 {strides = array<i32>} : memref<16x32xf32, #tpu.memory_space<vmem>>, vector<1x32xf32>,
    %485 = vector.extract_strided_slice %407 {offsets = [7, 0], sizes = [1, 32], strides = [1, 1]} : vector<8x32xf32> to vector<1x32xf32>
    %486 = arith.index_cast %481 : i32 to index
    %c0_267 = arith.constant 0 : index
    %487 = vector.load %arg11[%486, %c0_267] : memref<16x32xf32, #tpu.memory_space<vmem>>, vector<1x32xf32>
    tpu.vector_store %arg11[%486, %c0_267], %485 {strides = array<i32>} : memref<16x32xf32, #tpu.memory_space<vmem>>, vector<1x32xf32>,
    %c2_i32_268 = arith.constant 2 : i32
    %488 = arith.cmpi eq, %arg0, %c2_i32_268 : i32
    %489 = arith.extui %488 : i1 to i32
    %c0_i32_269 = arith.constant 0 : i32
    %490 = arith.cmpi ne, %489, %c0_i32_269 : i32
    scf.if %490 {
      %c0_270 = arith.constant 0 : index
      %c0_271 = arith.constant 0 : index
      %491 = vector.load %arg8[%c0_270, %c0_271] : memref<8x32xf32, #tpu.memory_space<vmem>>, vector<8x32xf32>
      tpu.vector_store %arg8[%c0_270, %c0_271], %405 {strides = array<i32>} : memref<8x32xf32, #tpu.memory_space<vmem>>, vector<8x32xf32>,
      %c0_272 = arith.constant 0 : index
      %c0_273 = arith.constant 0 : index
      %492 = vector.load %arg9[%c0_272, %c0_273] : memref<8x32xf32, #tpu.memory_space<vmem>>, vector<8x32xf32>
      tpu.vector_store %arg9[%c0_272, %c0_273], %407 {strides = array<i32>} : memref<8x32xf32, #tpu.memory_space<vmem>>, vector<8x32xf32>,
    } else {
    }
    return
  }
  func.func @transform_0(%arg0: i32, %arg1: memref<96xi32, #tpu.memory_space<smem>>, %arg2: memref<24xi32, #tpu.memory_space<smem>>) -> (i32, i32, i32) {
    %c0_i32 = arith.constant 0 : i32
    %c0_i32_0 = arith.constant 0 : i32
    %c0_i32_1 = arith.constant 0 : i32
    return %arg0, %c0_i32, %c0_i32_0 : i32, i32, i32
  }
  func.func @transform_1(%arg0: i32, %arg1: memref<96xi32, #tpu.memory_space<smem>>, %arg2: memref<24xi32, #tpu.memory_space<smem>>) -> (i32, i32) {
    %c0_i32 = arith.constant 0 : i32
    %c0_i32_0 = arith.constant 0 : i32
    %c0_i32_1 = arith.constant 0 : i32
    return %c0_i32, %c0_i32_0 : i32, i32
  }
  func.func @transform_2(%arg0: i32, %arg1: memref<96xi32, #tpu.memory_space<smem>>, %arg2: memref<24xi32, #tpu.memory_space<smem>>) -> (i32, i32) {
    %c0_i32 = arith.constant 0 : i32
    %c0_i32_0 = arith.constant 0 : i32
    %c0_i32_1 = arith.constant 0 : i32
    return %c0_i32, %c0_i32_0 : i32, i32
  }
  func.func @transform_3(%arg0: i32, %arg1: memref<96xi32, #tpu.memory_space<smem>>, %arg2: memref<24xi32, #tpu.memory_space<smem>>) -> (i32, i32) {
    %c0_i32 = arith.constant 0 : i32
    %c0_i32_0 = arith.constant 0 : i32
    %c0_i32_1 = arith.constant 0 : i32
    return %c0_i32, %c0_i32_0 : i32, i32
  }
  func.func @transform_4(%arg0: i32, %arg1: memref<96xi32, #tpu.memory_space<smem>>, %arg2: memref<24xi32, #tpu.memory_space<smem>>) -> (i32, i32) {
    %c0_i32 = arith.constant 0 : i32
    %c0_i32_0 = arith.constant 0 : i32
    %c0_i32_1 = arith.constant 0 : i32
    return %c0_i32, %c0_i32_0 : i32, i32
  }
  func.func @transform_5(%arg0: i32, %arg1: memref<96xi32, #tpu.memory_space<smem>>, %arg2: memref<24xi32, #tpu.memory_space<smem>>) -> (i32, i32) {
    %c0_i32 = arith.constant 0 : i32
    %c0_i32_0 = arith.constant 0 : i32
    %c0_i32_1 = arith.constant 0 : i32
    return %c0_i32, %c0_i32_0 : i32, i32
  }
  func.func @transform_6(%arg0: i32, %arg1: memref<96xi32, #tpu.memory_space<smem>>, %arg2: memref<24xi32, #tpu.memory_space<smem>>) -> (i32, i32) {
    %c0_i32 = arith.constant 0 : i32
    %c0_i32_0 = arith.constant 0 : i32
    %c0_i32_1 = arith.constant 0 : i32
    return %c0_i32, %c0_i32_0 : i32, i32
  }
}

</mosaic_0001>

<bundles_post_ra>
// kernel: tpu_custom_call.1
= control target key start
LH: loop header
LB: loop body
LE: loop exit
PB: predicated region body
PF: predicated region fallthrough
CT: control target
= control target key end

     0   :  { %s1408_s11 = smov [#allocation7]   ;;  %s1409_s12 = smov [#allocation8]   ;;  %s2017_s0 = inlined_call_operand.hbm [shape: s32[96], index: 0, kind: input, shape index: {}]   ;;  %s2018_s2 = inlined_call_operand.hbm [shape: f32[3,8,32], index: 2, kind: input, shape index: {}]   ;;  %s2019_s3 = inlined_call_operand.hbm [shape: f32[64,128], index: 3, kind: input, shape index: {}]   ;;  %s2020_s4 = inlined_call_operand.vmem [shape: f32[1,128], index: 4, kind: input, shape index: {}]   ;;  %s2021_s5 = inlined_call_operand.hbm [shape: f32[32,32], index: 5, kind: input, shape index: {}]   ;;  %s2022_s6 = inlined_call_operand.vmem [shape: f32[1,32], index: 6, kind: input, shape index: {}]   ;;  %s2023_s7 = inlined_call_operand.hbm [shape: f32[8,32], index: 7, kind: output, shape index: {0}]   ;;  %s2024_s8 = inlined_call_operand.hbm [shape: f32[8,32], index: 8, kind: output, shape index: {1}]   ;;  %s2025_s1 = inlined_call_operand.hbm [shape: s32[24], index: 1, kind: input, shape index: {}]  }
   0x1   :  { %2044 = sst [smem:[#allocation39_spill]] %s2018_s2  ;;  %s15_s29 = sshll.u32 %s2017_s0, 4  ;;  %s16_s29 = int_to_ptr.hbm [resolvable:$true] %s15_s29 }
   0x2   :  { %2045 = sst [smem:[#allocation40_spill]] %s2019_s3  ;;  %s20_s10 = sshll.u32 %s2025_s1, 4  ;;  %s21_s10 = int_to_ptr.hbm [resolvable:$true] %s20_s10 }
   0x3   :  { %2046 = sst [smem:[#allocation41_spill]] %s2021_s5 }
   0x4   :  { %2047 = sst [smem:[#allocation42_spill]] %s2023_s7 }
   0x5   :  { %2048 = sst [smem:[#allocation43_spill]] %s2024_s8 }
   0x6   :  { %18 = dma.hbm_to_smem %s16_s29, 16, %s1408_s11, [#allocation6] }
   0x7   :  { %23 = dma.hbm_to_smem %s21_s10, 16, %s1409_s12, [#allocation6] }
   0x8   :  { %1374 = dma.done.wait [#allocation6], 32 }
   0x9   :  { %1375 = vsyncadd [#allocation6], 4294967264 }
   0xa   :  { %26 = sfence }
   0xb   :  { %27 = vsyncpa [#allocation10], 0 }
   0xc   :  { %29 = vsyncpa [#allocation10 + $0x1], 0 }
   0xd   :  { %30 = vsyncpa [#allocation13], 0 }
   0xe   :  { %31 = vsyncpa [#allocation11], 0 }
   0xf   :  { %32 = vsyncpa [#allocation17], 0  ;;  %s1471_s13 = smov 0   ;;  %s1473_s0 = smov 0  }
  0x10   :  { %s1475_s14 = smov 0   ;;  %s1477_s1 = smov 0  }
  0x11 LB: > { %2049 = sst [smem:[#allocation23_spill]] %s1398_s0  ;;  %s1495_s18 = sadd.s32 4294967295, %s1406_s1   ;;  %s1406_s1 = sphi %s1477_s1, %s2099_s1   ;;  %s1402_s14 = sphi %s1475_s14, %s2102_s14   ;;  %s1398_s0 = sphi %s1473_s0, %s2101_s0   ;;  %s1394_s13 = sphi %s1471_s13, %s2100_s13  }
  0x12   : > { %2050 = sst [smem:[#allocation24_spill]] %s1402_s14  ;;  %p1046_p0 = scmp.ge.s32.totalorder %s1406_s1, 1 }
  0x13   : > { %s2051_s3 = sld [smem:[#allocation40_spill]]  ;;  %p59_p1 = scmp.eq.s32.totalorder %s1495_s18, 0 }
  0x14   : > { %2052 = sst [smem:[#allocation25_spill]] %s1495_s18  ;;  %p195_p2 = scmp.lt.s32.totalorder %s1406_s1, 4 }
  0x15   : > { %p1047_p3 = scmp.ne.s32.totalorder %s1495_s18, 0  ;;  %s1410_s20 = smov [#allocation12]  }
  0x16   : > { %p1501_p4 = pnand %p1046_p0, %p195_p2  ;;  %s208_s21 = sshll.u32 %s1410_s20, 4  ;;  %s209_s21 = int_to_ptr.vmem [resolvable:$true] %s208_s21 }
  0x17   : > { %s2054_s5 = sld [smem:[#allocation41_spill]]  ;;  %s1411_s25 = smov [#allocation14]  }
  0x18   : > { %p1098_p5 = pneg %p1501_p4  ;;  %s225_s26 = sshll.u32 %s1411_s25, 4  ;;  %s226_s26 = int_to_ptr.vmem [resolvable:$true] %s225_s26 }
  0x19   : > { %s206_s17 = sshll.u32 %s2051_s3, 4  ;;  %s1412_s27 = smov 128   ;;  %s207_s17 = int_to_ptr.hbm [resolvable:$true] %s206_s17 }
  0x1a   : > { %p1099_p6 = pnand %p1098_p5, %p59_p1  ;;  %s1413_s28 = smov 8  }
  0x1b   : > { %s1513_s29 = sadd.s32 1, %s1406_s1   ;;  %s45_s9 = sadd.s32 1, %s1402_s14 }
  0x1c   : > { %1101 = dma.hbm_to_vmem [thread:$0]  (!%p1099_p6), %s207_s17, 1024, %s209_s21, [#allocation13], %s1412_s27, %s1412_s27, %s1413_s28  }
  0x1d   : > { %s223_s24 = sshll.u32 %s2054_s5, 4  ;;  %2055 = sst [smem:[#allocation26_spill]] %s1513_s29  ;;  %s224_s24 = int_to_ptr.hbm [resolvable:$true] %s223_s24 }
  0x1e   : > { %1104 = dma.hbm_to_vmem [thread:$0]  (!%p1099_p6), %s224_s24, 512, %s226_s26, [#allocation13], %s1412_s27, %s1412_s27, %s1413_s28  }
  0x1f   : > { %s42_s30 = ssub.s32 %s1406_s1, %s1513_s29  ;;  %p52_p8 = scmp.ne.s32.totalorder %s1402_s14, %s1398_s0 }
  0x20   : > { %p43_p7 = scmp.eq.s32.totalorder %s42_s30, 0  ;;  %p53_p9 = scmp.eq.s32.totalorder %s1406_s1, 0 }
  0x21   : > { %p58_p10 = scmp.ne.s32.totalorder %s1398_s0, %s1394_s13  ;;  %p1111_p12 = scmp.lt.s32.totalorder %s1406_s1, 3 }
  0x22   : > { %s1524_s10 = scalar_select %p43_p7, %s1402_s14, %s45_s9  }
  0x23   : > { %p1528_p11 = por %p59_p1, %p58_p10  ;;  %s242_s12 = sand.u32 1, %s1402_s14  }
  0x24   : > { %2056 = sst [smem:[#allocation27_spill]] %s1524_s10  ;;  %s1051_s15 = sshll.u32 %s1406_s1, 3 }
  0x25   : > { %p54_p13 = por %p53_p9, %p52_p8  ;;  %s1050_s16 = sshll.u32 %s242_s12, 3 }
  0x26   : > { %s2058_s2 = sld [smem:[#allocation39_spill]]  ;;  %s246_s23 = scalar_lea.vmem [#allocation9], %s1050_s16 }
  0x27   : > { %s254_s24 = sshll.u32 %s246_s23, 4  ;;  %p1538_p0 = pnand %p1111_p12, %p54_p13  ;;  %s255_s24 = int_to_ptr.vmem [resolvable:$true] %s254_s24 }
  0x28   : > { %s243_s25 = scalar_lea.sflag [#allocation10], %s242_s12 }
  0x29   : > { %p1276_p5 = pneg %p1538_p0 }
  0x2c   : > { %s250_s21 = scalar_lea.hbm %s2058_s2, %s1051_s15  ;;  %s1279_s30 = scalar_lea.hbm %s2058_s2, 24 }
  0x2d   : > { %s252_s22 = sshll.u32 %s250_s21, 4  ;;  %s253_s22 = int_to_ptr.hbm [resolvable:$true] %s252_s22 }
  0x2e   : > { %s1272_s26 = sshra.s32 %s253_s22, 4  ;;  %s1273_s26 = int_to_ptr.hbm [resolvable:$true] %s1272_s26 }
  0x2f   : > { %s1274_s1 = scalar_lea.hbm %s1273_s26, 8  ;;  %p1280_p8 = scmp.lt.s32.totalorder %s1273_s26, %s2058_s2 }
  0x30   : > { %p1275_p2 = scmp.ne.s32.totalorder %s1273_s26, %s1274_s1  ;;  %p1281_p9 = scmp.lt.s32.totalorder %s1279_s30, %s1274_s1 }
  0x32   : > { %p1277_p6 = pnand %p1276_p5, %p1275_p2  ;;  %p1282_p10 = por %p1281_p9, %p1280_p8 }
  0x34   : > { %p1278_p7 = pneg %p1277_p6 }
  0x36   : > { %p1283_p12 = pnand %p1282_p10, %p1278_p7 }
  0x38   : > { %1286 = shalt.err (!%p1283_p12)
}
  0x39   : > { %1108 = dma.hbm_to_vmem [thread:$0]  (!%p1538_p0), %s253_s22, 128, %s255_s24, %s243_s25  }
  0x3a   : > { %263 = sbr.rel (%p1501_p4) target bundleno = 787 (0x313), region = 40 }
  0x3f   : > { %s265_s12 = sand.u32 1, %s1398_s0  }
  0x40   : > { %s1555_s16 = sshll.u32 %s265_s12, 3  ;;  %s266_s17 = scalar_lea.sflag [#allocation10], %s265_s12 }
  0x41   : > { %1377 = dma.done.wait (%p1528_p11), %s266_s17, 128  }
  0x42   : > { %1379 = vsyncadd (%p1528_p11), %s266_s17, 4294967168 }
  0x43   : > { %1381 = dma.done.wait (%p59_p1), [#allocation13], 1536  }
  0x44   : > { %1383 = vsyncadd (%p59_p1), [#allocation13], 4294965760  ;;  %307 = sbr.rel (%p1047_p3) target bundleno = 78 (0x4e), region = 56 }
  0x49   : > { %vm308_vm0 = vcmask 261120   ;;  %v1414_v0 = vmov 0.0  }
  0x4a   : > { %309 = vst.msk [vmem:[#allocation2] sm:$0xff] %vm308_vm0, %v1414_v0 }
  0x4b   : > { %310 = vst.msk [vmem:[#allocation2 + $0x8] sm:$0xff] %vm308_vm0, %v1414_v0 }
  0x4c   : > { %311 = vst.msk [vmem:[#allocation3] sm:$0xff] %vm308_vm0, %v1414_v0 }
  0x4d   : > { %312 = vst.msk [vmem:[#allocation3 + $0x8] sm:$0xff] %vm308_vm0, %v1414_v0 }
  0x4e PF: > { %s1569_s19 = sshll.u32 %s1495_s18, 5  ;;  %vm317_vm1 = vcmask 253952   ;;  %v596_v19 = vld [vmem:[#allocation12 + $0x38] sm:$0xff]  ;;  %v595_v20 = vld [vmem:[#allocation12 + $0x30] sm:$0xff]  ;;  %v594_v22 = vld [vmem:[#allocation12 + $0x28] sm:$0xff]  ;;  %vm587_vm2 = vcmask 261120  }
  0x4f   : > { %s1572_s11 = sld [smem:[#allocation7 + %s1569_s19]]  ;;  %s322_s21 = sadd.s32 4, %s1569_s19  ;;  %613 = vmatpush.msra.mxu0 %v596_v19  ;;  %v593_v24 = vld [vmem:[#allocation12 + $0x20] sm:$0xff]  ;;  %v592_v27 = vld [vmem:[#allocation12 + $0x18] sm:$0xff]  ;;  %v591_v29 = vld [vmem:[#allocation12 + $0x10] sm:$0xff]  ;;  %vm601_vm3 = vcmask 523264  }
  0x50   : > { %s1575_s22 = sld [smem:[#allocation7 + %s322_s21]]  ;;  %s330_s23 = sadd.s32 8, %s1569_s19  ;;  %v590_v31 = vld [vmem:[#allocation12 + $0x8] sm:$0xff]  ;;  %v589_v47 = vld [vmem:[#allocation12] sm:$0xff]  ;;  %v648_v48 = vld [vmem:[#allocation14 + $0x18] sm:$0xff] }
  0x51   : > { %s1578_s24 = sld [smem:[#allocation7 + %s330_s23]]  ;;  %s338_s13 = sadd.s32 12, %s1569_s19  ;;  %614 = vmatpush.msra.mxu0 %v595_v20  ;;  %v647_v49 = vld [vmem:[#allocation14 + $0x10] sm:$0xff]  ;;  %1076 = vmatpush.msra.mxu2 %v648_v48  ;;  %v646_v50 = vld [vmem:[#allocation14 + $0x8] sm:$0xff]  ;;  %v645_v51 = vld [vmem:[#allocation14] sm:$0xff] }
  0x52   : > { %s1581_s25 = sld [smem:[#allocation7 + %s338_s13]]  ;;  %s346_s26 = sadd.s32 16, %s1569_s19  ;;  %677 = vmatpush.msra.mxu1 %v648_v48  ;;  %v1162_v55 = vld [vmem:[%s2020_s4] ss:$0 sm:$0xff] }
  0x53   : > { %s1584_s1 = sld [smem:[#allocation7 + %s346_s26]]  ;;  %s354_s27 = sadd.s32 20, %s1569_s19  ;;  %615 = vmatpush.msra.mxu0 %v594_v22  ;;  %1077 = vmatpush.msra.mxu2 %v647_v49  ;;  %v1163_v62 = vld [vmem:[%s2022_s6] ss:$0 sm:$0xff] }
  0x54   : > { %s1587_s28 = sld [smem:[#allocation7 + %s354_s27]]  ;;  %s362_s30 = sadd.s32 24, %s1569_s19  ;;  %678 = vmatpush.msra.mxu1 %v647_v49 }
  0x55   : > { %2060 = sst [smem:[#allocation28_spill]] %s1572_s11  ;;  %s319_s15 = scalar_lea.vmem [#allocation3], %s1572_s11  ;;  %616 = vmatpush.msra.mxu0 %v593_v24  ;;  %1078 = vmatpush.msra.mxu2 %v646_v50 }
  0x56   : > { %s1590_s9 = sld [smem:[#allocation7 + %s362_s30]]  ;;  %v320_v1 = vld [vmem:[%s319_s15] sm:$0x1]  ;;  %s370_s12 = sadd.s32 28, %s1569_s19  ;;  %679 = vmatpush.msra.mxu1 %v646_v50 }
  0x57   : > { %321 = vst.msk [vmem:[#allocation5] sm:$0x1] %vm317_vm1, %v320_v1  ;;  %s327_s17 = scalar_lea.vmem [#allocation3], %s1575_s22  ;;  %s1596_s21 = sld [smem:[#allocation7 + %s370_s12]]  ;;  %617 = vmatpush.msra.mxu0 %v592_v27  ;;  %1079 = vmatpush.msra.mxu2 %v645_v51 }
  0x58   : > { %v328_v2 = vld [vmem:[%s327_s17] sm:$0x1]  ;;  %s335_s23 = scalar_lea.vmem [#allocation3], %s1578_s24  ;;  %s378_s13 = sadd.s32 1, %s1569_s19  ;;  %680 = vmatpush.msra.mxu1 %v645_v51 }
  0x59   : > { %329 = vst.msk [vmem:[#allocation5 + $0x1] sm:$0x1] %vm317_vm1, %v328_v2  ;;  %v336_v3 = vld [vmem:[%s335_s23] sm:$0x1]  ;;  %s343_s26 = scalar_lea.vmem [#allocation3], %s1581_s25  ;;  %s1603_s27 = sld [smem:[#allocation7 + %s378_s13]]  ;;  %618 = vmatpush.msra.mxu0 %v591_v29 }
  0x5a   : > { %337 = vst.msk [vmem:[#allocation5 + $0x2] sm:$0x1] %vm317_vm1, %v336_v3  ;;  %v344_v4 = vld [vmem:[%s343_s26] sm:$0x1]  ;;  %s351_s30 = scalar_lea.vmem [#allocation3], %s1584_s1  ;;  %s386_s15 = sadd.s32 5, %s1569_s19 }
  0x5b   : > { %345 = vst.msk [vmem:[#allocation5 + $0x3] sm:$0x1] %vm317_vm1, %v344_v4  ;;  %v352_v5 = vld [vmem:[%s351_s30] sm:$0x1]  ;;  %s359_s12 = scalar_lea.vmem [#allocation3], %s1587_s28  ;;  %s1610_s17 = sld [smem:[#allocation7 + %s386_s15]]  ;;  %619 = vmatpush.msra.mxu0 %v590_v31 }
  0x5c   : > { %353 = vst.msk [vmem:[#allocation5 + $0x4] sm:$0x1] %vm317_vm1, %v352_v5  ;;  %v360_v6 = vld [vmem:[%s359_s12] sm:$0x1]  ;;  %s367_s23 = scalar_lea.vmem [#allocation3], %s1590_s9  ;;  %s394_s13 = sadd.s32 9, %s1569_s19 }
  0x5d   : > { %361 = vst.msk [vmem:[#allocation5 + $0x5] sm:$0x1] %vm317_vm1, %v360_v6  ;;  %v368_v7 = vld [vmem:[%s367_s23] sm:$0x1]  ;;  %s402_s26 = sadd.s32 13, %s1569_s19  ;;  %s1617_s30 = sld [smem:[#allocation7 + %s394_s13]]  ;;  %620 = vmatpush.msra.mxu0 %v589_v47 }
  0x5e   : > { %369 = vst.msk [vmem:[#allocation5 + $0x6] sm:$0x1] %vm317_vm1, %v368_v7  ;;  %s375_s20 = scalar_lea.vmem [#allocation3], %s1596_s21  ;;  %s1620_s2 = sld [smem:[#allocation7 + %s402_s26]] }
  0x5f   : > { %v376_v8 = vld [vmem:[%s375_s20] sm:$0x1]  ;;  %s410_s15 = sadd.s32 17, %s1569_s19  ;;  %s383_s23 = scalar_lea.vmem [#allocation3], %s1603_s27 }
  0x60   : > { %377 = vst.msk [vmem:[#allocation5 + $0x7] sm:$0x1] %vm317_vm1, %v376_v8  ;;  %s1624_s12 = sld [smem:[#allocation7 + %s410_s15]]  ;;  %v384_v9 = vld [vmem:[%s383_s23] sm:$0x1]  ;;  %s418_s3 = sadd.s32 21, %s1569_s19 }
  0x61   : > { %s426_s5 = sadd.s32 25, %s1569_s19  ;;  %385 = vst.msk [vmem:[#allocation5 + $0x8] sm:$0x1] %vm317_vm1, %v384_v9  ;;  %s1630_s13 = sld [smem:[#allocation7 + %s418_s3]] }
  0x62   : > { %s391_s20 = scalar_lea.vmem [#allocation3], %s1610_s17  ;;  %s1633_s26 = sld [smem:[#allocation7 + %s426_s5]] }
  0x63   : > { %v392_v10 = vld [vmem:[%s391_s20] sm:$0x1]  ;;  %s434_s10 = sadd.s32 29, %s1569_s19  ;;  %s399_s23 = scalar_lea.vmem [#allocation3], %s1617_s30 }
  0x64   : > { %393 = vst.msk [vmem:[#allocation5 + $0x9] sm:$0x1] %vm317_vm1, %v392_v10  ;;  %s1637_s15 = sld [smem:[#allocation7 + %s434_s10]]  ;;  %v400_v11 = vld [vmem:[%s399_s23] sm:$0x1]  ;;  %s442_s14 = sadd.s32 2, %s1569_s19 }
  0x65   : > { %401 = vst.msk [vmem:[#allocation5 + $0xa] sm:$0x1] %vm317_vm1, %v400_v11  ;;  %s407_s3 = scalar_lea.vmem [#allocation3], %s1620_s2  ;;  %s1643_s0 = sld [smem:[#allocation7 + %s442_s14]] }
  0x66   : > { %v408_v12 = vld [vmem:[%s407_s3] sm:$0x1]  ;;  %s415_s5 = scalar_lea.vmem [#allocation3], %s1624_s12  ;;  %s450_s20 = sadd.s32 6, %s1569_s19 }
  0x67   : > { %409 = vst.msk [vmem:[#allocation5 + $0xb] sm:$0x1] %vm317_vm1, %v408_v12  ;;  %v416_v13 = vld [vmem:[%s415_s5] sm:$0x1]  ;;  %s458_s10 = sadd.s32 10, %s1569_s19  ;;  %s1650_s23 = sld [smem:[#allocation7 + %s450_s20]] }
  0x68   : > { %417 = vst.msk [vmem:[#allocation5 + $0xc] sm:$0x1] %vm317_vm1, %v416_v13  ;;  %s423_s29 = scalar_lea.vmem [#allocation3], %s1630_s13  ;;  %s1653_s3 = sld [smem:[#allocation7 + %s458_s10]]  ;;  %v575_v39 = vld [vmem:[#allocation5] sm:$0xff] }
  0x69   : > { %v424_v14 = vld [vmem:[%s423_s29] sm:$0x1]  ;;  %s431_s14 = scalar_lea.vmem [#allocation3], %s1633_s26  ;;  %s466_s5 = sadd.s32 14, %s1569_s19  ;;  %1060 = vmatmul.msk.f32.vlgmr.msra.gmra.mxu1 %vm587_vm2, %v575_v39 }
  0x6a   : > { %425 = vst.msk [vmem:[#allocation5 + $0xd] sm:$0x1] %vm317_vm1, %v424_v14  ;;  %v432_v15 = vld [vmem:[%s431_s14] sm:$0x1]  ;;  %s439_s8 = scalar_lea.vmem [#allocation3], %s1637_s15  ;;  %s1660_s7 = sld [smem:[#allocation7 + %s466_s5]] }
  0x6b   : > { %2061 = sst [smem:[#allocation29_spill]] %s1643_s0  ;;  %433 = vst.msk [vmem:[#allocation5 + $0xe] sm:$0x1] %vm317_vm1, %v432_v15  ;;  %v440_v16 = vld [vmem:[%s439_s8] sm:$0x1]  ;;  %s474_s20 = sadd.s32 18, %s1569_s19 }
  0x6c   : > { %441 = vst.msk [vmem:[#allocation5 + $0xf] sm:$0x1] %vm317_vm1, %v440_v16  ;;  %s1664_s29 = sld [smem:[#allocation7 + %s474_s20]]  ;;  %s447_s10 = scalar_lea.vmem [#allocation3], %s1643_s0 }
  0x6d   : > { %2062 = sst [smem:[#allocation30_spill]] %s1650_s23  ;;  %v448_v17 = vld [vmem:[%s447_s10] sm:$0x1]  ;;  %s482_s18 = sadd.s32 22, %s1569_s19 }
  0x6e   : > { %2063 = sst [smem:[#allocation31_spill]] %s1653_s3  ;;  %s490_s11 = sadd.s32 26, %s1569_s19  ;;  %449 = vst.msk [vmem:[#allocation5 + $0x10] sm:$0x1] %vm317_vm1, %v448_v17 }
  0x6f   : > { %s1670_s14 = sld [smem:[#allocation7 + %s482_s18]]  ;;  %s455_s8 = scalar_lea.vmem [#allocation3], %s1650_s23 }
  0x70   : > { %2064 = sst [smem:[#allocation32_spill]] %s1660_s7  ;;  %v456_v18 = vld [vmem:[%s455_s8] sm:$0x1]  ;;  %s463_s20 = scalar_lea.vmem [#allocation3], %s1653_s3 }
  0x71   : > { %s1673_s5 = sld [smem:[#allocation7 + %s490_s11]]  ;;  %457 = vst.msk [vmem:[#allocation5 + $0x11] sm:$0x1] %vm317_vm1, %v456_v18  ;;  %v464_v21 = vld [vmem:[%s463_s20] sm:$0x1]  ;;  %s498_s10 = sadd.s32 30, %s1569_s19 }
  0x72   : > { %2065 = sst [smem:[#allocation33_spill]] %s1664_s29  ;;  %s506_s0 = sadd.s32 3, %s1569_s19  ;;  %465 = vst.msk [vmem:[#allocation5 + $0x12] sm:$0x1] %vm317_vm1, %v464_v21 }
  0x73   : > { %s1680_s18 = sld [smem:[#allocation7 + %s498_s10]]  ;;  %s471_s11 = scalar_lea.vmem [#allocation3], %s1660_s7  ;;  %v576_v40 = vld [vmem:[#allocation5 + $0x8] sm:$0xff] }
  0x74   : > { %v472_v23 = vld [vmem:[%s471_s11] sm:$0x1]  ;;  %s1683_s8 = sld [smem:[#allocation7 + %s506_s0]]  ;;  %s479_s20 = scalar_lea.vmem [#allocation3], %s1664_s29  ;;  %v580_v42 = vadd.f32 %v576_v40, %v575_v39  ;;  %1061 = vmatmul.msk.f32.gmra.mxu1 %vm587_vm2, %v576_v40 }
  0x75   : > { %2066 = sst [smem:[#allocation34_spill]] %s1670_s14  ;;  %473 = vst.msk [vmem:[#allocation5 + $0x13] sm:$0x1] %vm317_vm1, %v472_v23  ;;  %v480_v25 = vld [vmem:[%s479_s20] sm:$0x1]  ;;  %s514_s3 = sadd.s32 7, %s1569_s19 }
  0x76   : > { %s522_s23 = sadd.s32 11, %s1569_s19  ;;  %481 = vst.msk [vmem:[#allocation5 + $0x14] sm:$0x1] %vm317_vm1, %v480_v25  ;;  %s1690_s10 = sld [smem:[#allocation7 + %s514_s3]] }
  0x77   : > { %2067 = sst [smem:[#allocation35_spill]] %s1673_s5  ;;  %s487_s11 = scalar_lea.vmem [#allocation3], %s1670_s14 }
  0x78   : > { %v488_v26 = vld [vmem:[%s487_s11] sm:$0x1]  ;;  %s1693_s0 = sld [smem:[#allocation7 + %s522_s23]]  ;;  %s495_s7 = scalar_lea.vmem [#allocation3], %s1673_s5 }
  0x79   : > { %2068 = sst [smem:[#allocation36_spill]] %s1680_s18  ;;  %489 = vst.msk [vmem:[#allocation5 + $0x15] sm:$0x1] %vm317_vm1, %v488_v26  ;;  %v496_v28 = vld [vmem:[%s495_s7] sm:$0x1]  ;;  %s530_s20 = sadd.s32 15, %s1569_s19 }
  0x7a   : > { %2069 = sst [smem:[#allocation37_spill]] %s1683_s8  ;;  %s538_s29 = sadd.s32 19, %s1569_s19  ;;  %497 = vst.msk [vmem:[#allocation5 + $0x16] sm:$0x1] %vm317_vm1, %v496_v28 }
  0x7b   : > { %s1700_s3 = sld [smem:[#allocation7 + %s530_s20]]  ;;  %s503_s11 = scalar_lea.vmem [#allocation3], %s1680_s18 }
  0x7c   : > { %2070 = sst [smem:[#allocation38_spill]] %s1690_s10  ;;  %v504_v30 = vld [vmem:[%s503_s11] sm:$0x1]  ;;  %s511_s7 = scalar_lea.vmem [#allocation3], %s1683_s8 }
  0x7d   : > { %s1703_s23 = sld [smem:[#allocation7 + %s538_s29]]  ;;  %505 = vst.msk [vmem:[#allocation5 + $0x17] sm:$0x1] %vm317_vm1, %v504_v30  ;;  %v512_v32 = vld [vmem:[%s511_s7] sm:$0x1]  ;;  %s546_s5 = sadd.s32 23, %s1569_s19 }
  0x7e   : > { %s554_s14 = sadd.s32 27, %s1569_s19  ;;  %513 = vst.msk [vmem:[#allocation5 + $0x18] sm:$0x1] %vm317_vm1, %v512_v32  ;;  %s1710_s20 = sld [smem:[#allocation7 + %s546_s5]] }
  0x7f   : > { %s519_s11 = scalar_lea.vmem [#allocation3], %s1690_s10  ;;  %s1713_s29 = sld [smem:[#allocation7 + %s554_s14]] }
  0x80   : > { %v520_v33 = vld [vmem:[%s519_s11] sm:$0x1]  ;;  %s527_s18 = scalar_lea.vmem [#allocation3], %s1693_s0  ;;  %s562_s7 = sadd.s32 31, %s1569_s19 }
  0x81   : > { %521 = vst.msk [vmem:[#allocation5 + $0x19] sm:$0x1] %vm317_vm1, %v520_v33  ;;  %v528_v34 = vld [vmem:[%s527_s18] sm:$0x1]  ;;  %s1719_s8 = sld [smem:[#allocation7 + %s562_s7]]  ;;  %s535_s5 = scalar_lea.vmem [#allocation3], %s1700_s3 }
  0x82   : > { %529 = vst.msk [vmem:[#allocation5 + $0x1a] sm:$0x1] %vm317_vm1, %v528_v34  ;;  %v536_v35 = vld [vmem:[%s535_s5] sm:$0x1]  ;;  %s2071_s11 = scalar_lea.vmem [#allocation9], %s1555_s16  ;;  %s1416_s16 = smov 64  }
  0x83   : > { %537 = vst.msk [vmem:[#allocation5 + $0x1b] sm:$0x1] %vm317_vm1, %v536_v35  ;;  %s543_s10 = scalar_lea.vmem [#allocation3], %s1703_s23  ;;  %v570_v52 = vld [vmem:[%s2071_s11] sm:$0xff]  ;;  %s332_s11 = scalar_lea.vmem [#allocation2], %s1578_s24 }
  0x84   : > { %v544_v36 = vld [vmem:[%s543_s10] sm:$0x1]  ;;  %s551_s14 = scalar_lea.vmem [#allocation3], %s1710_s20  ;;  %v577_v43 = vld [vmem:[#allocation5 + $0x10] sm:$0xff]  ;;  %s1415_s10 = smov 32  }
  0x85   : > { %545 = vst.msk [vmem:[#allocation5 + $0x1c] sm:$0x1] %vm317_vm1, %v544_v36  ;;  %v552_v37 = vld [vmem:[%s551_s14] sm:$0x1]  ;;  %s559_s18 = scalar_lea.vmem [#allocation3], %s1713_s29  ;;  %v581_v44 = vadd.f32 %v580_v42, %v577_v43  ;;  %1062 = vmatmul.msk.f32.vlgmr.msra.gmra.mxu2 %vm587_vm2, %v577_v43  ;;  %s340_s7 = scalar_lea.vmem [#allocation2], %s1581_s25 }
  0x86   : > { %553 = vst.msk [vmem:[#allocation5 + $0x1d] sm:$0x1] %vm317_vm1, %v552_v37  ;;  %v560_v38 = vld [vmem:[%s559_s18] sm:$0x1]  ;;  %s348_s5 = scalar_lea.vmem [#allocation2], %s1584_s1  ;;  %s372_s24 = scalar_lea.vmem [#allocation2], %s1596_s21 }
  0x87   : > { %561 = vst.msk [vmem:[#allocation5 + $0x1e] sm:$0x1] %vm317_vm1, %v560_v38  ;;  %s567_s19 = scalar_lea.vmem [#allocation3], %s1719_s8  ;;  %v333_v0 = vld [vmem:[%s332_s11] sm:$0x1]  ;;  %s380_s25 = scalar_lea.vmem [#allocation2], %s1603_s27 }
  0x88   : > { %v568_v41 = vld [vmem:[%s567_s19] sm:$0x1]  ;;  %s324_s19 = scalar_lea.vmem [#allocation2], %s1575_s22  ;;  %334 = vst.msk [vmem:[#allocation4 + $0x2] sm:$0x1] %vm317_vm1, %v333_v0  ;;  %s364_s22 = scalar_lea.vmem [#allocation2], %s1590_s9 }
  0x89   : > { %569 = vst.msk [vmem:[#allocation5 + $0x1f] sm:$0x1] %vm317_vm1, %v568_v41  ;;  %v325_v63 = vld [vmem:[%s324_s19] sm:$0x1]  ;;  %s388_s1 = scalar_lea.vmem [#allocation2], %s1610_s17  ;;  %s404_s9 = scalar_lea.vmem [#allocation2], %s1620_s2 }
  0x8a   : > { %v341_v1 = vld [vmem:[%s340_s7] sm:$0x1]  ;;  %326 = vst.msk [vmem:[#allocation4 + $0x1] sm:$0x1] %vm317_vm1, %v325_v63  ;;  %s412_s21 = scalar_lea.vmem [#allocation2], %s1624_s12  ;;  %s2072_s27 = sld [smem:[#allocation29_spill]] }
  0x8b   : > { %v349_v4 = vld [vmem:[%s348_s5] sm:$0x1]  ;;  %342 = vst.msk [vmem:[#allocation4 + $0x3] sm:$0x1] %vm317_vm1, %v341_v1  ;;  %s420_s17 = scalar_lea.vmem [#allocation2], %s1630_s13  ;;  %s428_s2 = scalar_lea.vmem [#allocation2], %s1633_s26 }
  0x8c   : > { %v365_v7 = vld [vmem:[%s364_s22] sm:$0x1]  ;;  %350 = vst.msk [vmem:[#allocation4 + $0x4] sm:$0x1] %vm317_vm1, %v349_v4  ;;  %s2074_s14 = sld [smem:[#allocation31_spill]]  ;;  %s436_s18 = scalar_lea.vmem [#allocation2], %s1637_s15 }
  0x8d   : > { %v373_v10 = vld [vmem:[%s372_s24] sm:$0x1]  ;;  %366 = vst.msk [vmem:[#allocation4 + $0x6] sm:$0x1] %vm317_vm1, %v365_v7  ;;  %s2075_s12 = sld [smem:[#allocation32_spill]] }
  0x8e   : > { %v381_v12 = vld [vmem:[%s380_s25] sm:$0x1]  ;;  %374 = vst.msk [vmem:[#allocation4 + $0x7] sm:$0x1] %vm317_vm1, %v373_v10  ;;  %s2076_s19 = sld [smem:[#allocation33_spill]] }
  0x8f   : > { %v389_v15 = vld [vmem:[%s388_s1] sm:$0x1]  ;;  %382 = vst.msk [vmem:[#allocation4 + $0x8] sm:$0x1] %vm317_vm1, %v381_v12  ;;  %s2077_s7 = sld [smem:[#allocation34_spill]] }
  0x90   : > { %v578_v45 = vld [vmem:[#allocation5 + $0x18] sm:$0xff]  ;;  %390 = vst.msk [vmem:[#allocation4 + $0x9] sm:$0x1] %vm317_vm1, %v389_v15  ;;  %v405_v22 = vld [vmem:[%s404_s9] sm:$0x1]  ;;  %s444_s11 = scalar_lea.vmem [#allocation2], %s2072_s27 }
  0x91   : > { %v582_v46 = vadd.f32 %v581_v44, %v578_v45  ;;  %1063 = vmatmul.msk.f32.gmra.mxu2 %vm587_vm2, %v578_v45  ;;  %v413_v23 = vld [vmem:[%s412_s21] sm:$0x1]  ;;  %406 = vst.msk [vmem:[#allocation4 + $0xb] sm:$0x1] %vm317_vm1, %v405_v22  ;;  %s2078_s15 = sld [smem:[#allocation35_spill]] }
  0x92   : > { %v421_v28 = vld [vmem:[%s420_s17] sm:$0x1]  ;;  %414 = vst.msk [vmem:[#allocation4 + $0xc] sm:$0x1] %vm317_vm1, %v413_v23  ;;  %s460_s26 = scalar_lea.vmem [#allocation2], %s2074_s14  ;;  %s2079_s22 = sld [smem:[#allocation36_spill]] }
  0x93   : > { %584 = vrot.lane.b32.xlu0 %v582_v46, %s1415_s10  ;;  %v429_v29 = vld [vmem:[%s428_s2] sm:$0x1]  ;;  %422 = vst.msk [vmem:[#allocation4 + $0xd] sm:$0x1] %vm317_vm1, %v421_v28  ;;  %s468_s5 = scalar_lea.vmem [#allocation2], %s2075_s12  ;;  %s2080_s25 = sld [smem:[#allocation37_spill]] }
  0x94   : > { %v437_v30 = vld [vmem:[%s436_s18] sm:$0x1]  ;;  %430 = vst.msk [vmem:[#allocation4 + $0xe] sm:$0x1] %vm317_vm1, %v429_v29  ;;  %s2081_s1 = sld [smem:[#allocation38_spill]]  ;;  %s524_s17 = scalar_lea.vmem [#allocation2], %s1693_s0 }
  0x95   : > { %v445_v31 = vld [vmem:[%s444_s11] sm:$0x1]  ;;  %438 = vst.msk [vmem:[#allocation4 + $0xf] sm:$0x1] %vm317_vm1, %v437_v30  ;;  %s484_s24 = scalar_lea.vmem [#allocation2], %s2077_s7  ;;  %s540_s2 = scalar_lea.vmem [#allocation2], %s1703_s23 }
  0x96   : > { %v461_v34 = vld [vmem:[%s460_s26] sm:$0x1]  ;;  %446 = vst.msk [vmem:[#allocation4 + $0x10] sm:$0x1] %vm317_vm1, %v445_v31  ;;  %s2082_s14 = sld [smem:[#allocation28_spill]]  ;;  %s548_s12 = scalar_lea.vmem [#allocation2], %s1710_s20 }
  0x97   : > { %v469_v35 = vld [vmem:[%s468_s5] sm:$0x1]  ;;  %462 = vst.msk [vmem:[#allocation4 + $0x12] sm:$0x1] %vm317_vm1, %v461_v34  ;;  %s556_s0 = scalar_lea.vmem [#allocation2], %s1713_s29 }
  0x98   : > { %v485_v40 = vld [vmem:[%s484_s24] sm:$0x1]  ;;  %470 = vst.msk [vmem:[#allocation4 + $0x13] sm:$0x1] %vm317_vm1, %v469_v35  ;;  %s500_s9 = scalar_lea.vmem [#allocation2], %s2079_s22 }
  0x99   : > { %v501_v47 = vld [vmem:[%s500_s9] sm:$0x1]  ;;  %486 = vst.msk [vmem:[#allocation4 + $0x15] sm:$0x1] %vm317_vm1, %v485_v40  ;;  %s508_s21 = scalar_lea.vmem [#allocation2], %s2080_s25 }
  0x9a   : > { %v509_v49 = vld [vmem:[%s508_s21] sm:$0x1]  ;;  %s516_s27 = scalar_lea.vmem [#allocation2], %s2081_s1  ;;  %502 = vst.msk [vmem:[#allocation4 + $0x17] sm:$0x1] %vm317_vm1, %v501_v47 }
  0x9b   : > { %v517_v50 = vld [vmem:[%s516_s27] sm:$0x1]  ;;  %510 = vst.msk [vmem:[#allocation4 + $0x18] sm:$0x1] %vm317_vm1, %v509_v49 }
  0x9c   : > { %518 = vst.msk [vmem:[#allocation4 + $0x19] sm:$0x1] %vm317_vm1, %v517_v50  ;;  %s315_s23 = scalar_lea.vmem [#allocation2], %s2082_s14 }
  0x9d   : > { %v316_v1 = vld [vmem:[%s315_s23] sm:$0x1] }
  0x9e   : > { %318 = vst.msk [vmem:[#allocation4] sm:$0x1] %vm317_vm1, %v316_v1 }
  0xe6   : > { %v682_v59 = vpop.f32.mrf.mxu1 }
  0xe7   : > { %v683_v13 = vadd.f32 %v1163_v62, %v682_v59 }
  0xf1   : > { %v685_v2 = vpop.f32.mrf.mxu1 }
  0xf2   : > { %v686_v8 = vadd.f32 %v1163_v62, %v685_v2 }
 0x105   : > { %v585_v53 = vpop.permute.xlu0 %584 }
 0x106   : > { %v588_v54 = vsel %vm587_vm2, %v570_v52, %v585_v53  ;;  %v525_v52 = vld [vmem:[%s524_s17] sm:$0x1] }
 0x107   : > { %1058 = vmatmul.msk.f32.vlgmr.msra.gmra.mxu0 %vm601_vm3, %v588_v54  ;;  %v541_v54 = vld [vmem:[%s540_s2] sm:$0x1]  ;;  %526 = vst.msk [vmem:[#allocation4 + $0x1a] sm:$0x1] %vm317_vm1, %v525_v52 }
 0x108   : > { %v688_v60 = vpop.f32.mrf.mxu2  ;;  %542 = vst.msk [vmem:[#allocation4 + $0x1c] sm:$0x1] %vm317_vm1, %v541_v54 }
 0x109   : > { %v689_v14 = vadd.f32 %v1163_v62, %v688_v60 }
 0x114   : > { %v691_v3 = vpop.f32.mrf.mxu2 }
 0x115   : > { %v692_v9 = vadd.f32 %v1163_v62, %v691_v3 }
 0x184   : > { %v622_v56 = vpop.f32.mrf.mxu0 }
 0x185   : > { %v623_v57 = vadd.f32 %v1162_v55, %v622_v56 }
 0x187   : > { %1164 = vtanh.f32 %v623_v57  ;;  %695 = vrot.lane.b32.xlu0 %v623_v57, %s1415_s10  ;;  %v1059_v61 = vmul.f32 -1.442695, %v623_v57  ;;  %v549_v57 = vld [vmem:[%s548_s12] sm:$0x1] }
 0x188   : > { %550 = vst.msk [vmem:[#allocation4 + $0x1d] sm:$0x1] %vm317_vm1, %v549_v57 }
 0x189   : > { %1166 = vpow2.f32 %v1059_v61  ;;  %v557_v61 = vld [vmem:[%s556_s0] sm:$0x1]  ;;  %s1417_s0 = smov 96  }
 0x18a   : > { %558 = vst.msk [vmem:[#allocation4 + $0x1e] sm:$0x1] %vm317_vm1, %v557_v61 }
 0x18d   : > { %v1165_v58 = vpop.eup %1164 }
 0x18e   : > { %787 = vrot.lane.b32.xlu1 %v1165_v58, %s1416_s16  ;;  %s356_s16 = scalar_lea.vmem [#allocation2], %s1587_s28  ;;  %s396_s28 = scalar_lea.vmem [#allocation2], %s1617_s30 }
 0x18f   : > { %v1167_v5 = vpop.eup %1166  ;;  %v357_v6 = vld [vmem:[%s356_s16] sm:$0x1]  ;;  %s2073_s30 = sld [smem:[#allocation30_spill]]  ;;  %s476_s16 = scalar_lea.vmem [#allocation2], %s2076_s19 }
 0x190   : > { %v1757_v11 = vadd.f32 1.0, %v1167_v5  ;;  %358 = vst.msk [vmem:[#allocation4 + $0x5] sm:$0x1] %vm317_vm1, %v357_v6  ;;  %v397_v21 = vld [vmem:[%s396_s28] sm:$0x1]  ;;  %s492_s28 = scalar_lea.vmem [#allocation2], %s2078_s15 }
 0x191   : > { %398 = vst.msk [vmem:[#allocation4 + $0xa] sm:$0x1] %vm317_vm1, %v397_v21  ;;  %v477_v37 = vld [vmem:[%s476_s16] sm:$0x1] }
 0x192   : > { %1168 = vrcp.f32 %v1757_v11  ;;  %v493_v44 = vld [vmem:[%s492_s28] sm:$0x1]  ;;  %478 = vst.msk [vmem:[#allocation4 + $0x14] sm:$0x1] %vm317_vm1, %v477_v37  ;;  %v640_v47 = vand.u32 2147483648, %v1757_v11 }
 0x193   : > { %494 = vst.msk [vmem:[#allocation4 + $0x16] sm:$0x1] %vm317_vm1, %v493_v44 }
 0x195   : > { %s452_s13 = scalar_lea.vmem [#allocation2], %s2073_s30  ;;  %s532_s30 = scalar_lea.vmem [#allocation2], %s1700_s3 }
 0x196   : > { %v453_v32 = vld [vmem:[%s452_s13] sm:$0x1]  ;;  %s564_s3 = scalar_lea.vmem [#allocation2], %s1719_s8  ;;  %s2085_s8 = sld [smem:[#allocation25_spill]] }
 0x197   : > { %454 = vst.msk [vmem:[#allocation4 + $0x11] sm:$0x1] %vm317_vm1, %v453_v32  ;;  %v533_v53 = vld [vmem:[%s532_s30] sm:$0x1] }
 0x198   : > { %v1780_v33 = vpop.eup %1168  ;;  %534 = vst.msk [vmem:[#allocation4 + $0x1b] sm:$0x1] %vm317_vm1, %v533_v53  ;;  %v565_v0 = vld [vmem:[%s564_s3] sm:$0x1] }
 0x199   : > { %v630_v41 = vmul.f32 %v1780_v33, %v1757_v11  ;;  %vm635_vm8 = vweird.f32 %v1780_v33  ;;  %566 = vst.msk [vmem:[#allocation4 + $0x1f] sm:$0x1] %vm317_vm1, %v565_v0 }
 0x19b   : > { %v631_v51 = vsub.f32 1.0, %v630_v41 }
 0x19c   : > { %s1875_s20 = sshll.u32 %s2085_s8, 3  ;;  %p1069_p1 = scmp.ne.s32.totalorder %s2085_s8, 2 }
 0x19d   : > { %v632_v2 = vmul.f32 %v1780_v33, %v631_v51  ;;  %s808_s29 = sadd.s32 1, %s1875_s20  ;;  %s815_s18 = sadd.s32 2, %s1875_s20 }
 0x19e   : > { %s1916_s19 = sld [smem:[#allocation8 + %s1875_s20]]  ;;  %s822_s11 = sadd.s32 3, %s1875_s20 }
 0x19f   : > { %s1920_s13 = sld [smem:[#allocation8 + %s808_s29]]  ;;  %s829_s7 = sadd.s32 4, %s1875_s20 }
 0x1a0   : > { %v574_v50 = vld [vmem:[#allocation4 + $0x18] sm:$0xff]  ;;  %s1925_s26 = sld [smem:[#allocation8 + %s815_s18]]  ;;  %s836_s15 = sadd.s32 5, %s1875_s20 }
 0x1a1   : > { %s1934_s5 = sld [smem:[#allocation8 + %s822_s11]]  ;;  %s843_s16 = sadd.s32 6, %s1875_s20 }
 0x1a2   : > { %s1940_s22 = sld [smem:[#allocation8 + %s829_s7]]  ;;  %s850_s24 = sadd.s32 7, %s1875_s20 }
 0x1a3   : > { %s1943_s25 = sld [smem:[#allocation8 + %s836_s15]] }
 0x1a4   : > { %s1945_s1 = sld [smem:[#allocation8 + %s843_s16]]  ;;  %s800_s9 = scalar_lea.vmem [#allocation2], %s1916_s19 }
 0x1a5   : > { %s1947_s28 = sld [smem:[#allocation8 + %s850_s24]]  ;;  %s810_s21 = scalar_lea.vmem [#allocation2], %s1920_s13 }
 0x1a6   : > { %s817_s27 = scalar_lea.vmem [#allocation2], %s1925_s26  ;;  %s806_s3 = scalar_lea.vmem [#allocation3], %s1916_s19 }
 0x1a7   : > { %s824_s17 = scalar_lea.vmem [#allocation2], %s1934_s5  ;;  %s813_s23 = scalar_lea.vmem [#allocation3], %s1920_s13 }
 0x1a8   : > { %s831_s30 = scalar_lea.vmem [#allocation2], %s1940_s22  ;;  %s820_s20 = scalar_lea.vmem [#allocation3], %s1925_s26 }
 0x1a9   : > { %s838_s2 = scalar_lea.vmem [#allocation2], %s1943_s25  ;;  %s827_s29 = scalar_lea.vmem [#allocation3], %s1934_s5 }
 0x1aa   : > { %s845_s14 = scalar_lea.vmem [#allocation2], %s1945_s1  ;;  %s841_s18 = scalar_lea.vmem [#allocation3], %s1943_s25 }
 0x1ab   : > { %s852_s12 = scalar_lea.vmem [#allocation2], %s1947_s28  ;;  %s848_s11 = scalar_lea.vmem [#allocation3], %s1945_s1 }
 0x1ac   : > { %s855_s19 = scalar_lea.vmem [#allocation3], %s1947_s28 }
 0x1f9   : > { %v696_v16 = vpop.permute.xlu0 %695 }
 0x1fa   : > { %v698_v17 = vadd.f32 %v696_v16, %v683_v13  ;;  %v720_v18 = vadd.f32 %v696_v16, %v686_v8  ;;  %v742_v19 = vadd.f32 %v696_v16, %v689_v14  ;;  %v764_v20 = vadd.f32 %v696_v16, %v692_v9 }
 0x1fc   : > { %v1064_v24 = vmul.f32 -1.442695, %v698_v17  ;;  %v1065_v25 = vmul.f32 -1.442695, %v720_v18  ;;  %v1066_v26 = vmul.f32 -1.442695, %v742_v19 }
 0x1fd   : > { %v1067_v27 = vmul.f32 -1.442695, %v764_v20 }
 0x1fe   : > { %1170 = vpow2.f32 %v1064_v24 }
 0x1ff   : > { %1172 = vpow2.f32 %v1065_v25  ;;  %v572_v25 = vld [vmem:[#allocation4 + $0x8] sm:$0xff] }
 0x200   : > { %1174 = vpow2.f32 %v1066_v26 }
 0x201   : > { %1176 = vpow2.f32 %v1067_v27 }
 0x204   : > { %v1171_v36 = vpop.eup %1170 }
 0x205   : > { %v1173_v38 = vpop.eup %1172  ;;  %v1788_v39 = vadd.f32 1.0, %v1171_v36 }
 0x206   : > { %v1175_v42 = vpop.eup %1174  ;;  %v1794_v43 = vadd.f32 1.0, %v1173_v38 }
 0x207   : > { %v1177_v45 = vpop.eup %1176  ;;  %1178 = vrcp.f32 %v1788_v39  ;;  %v1799_v46 = vadd.f32 1.0, %v1175_v42  ;;  %v712_v55 = vand.u32 2147483647, %v1788_v39  ;;  %v714_v58 = vand.u32 2147483648, %v1788_v39 }
 0x208   : > { %1180 = vrcp.f32 %v1794_v43  ;;  %v1804_v48 = vadd.f32 1.0, %v1177_v45  ;;  %vm708_vm4 = vweird.f32 %v1788_v39  ;;  %vm730_vm5 = vweird.f32 %v1794_v43 }
 0x209   : > { %1182 = vrcp.f32 %v1799_v46  ;;  %vm1842_vm6 = vcmp.eq.f32.partialorder %v712_v55, 8.507059e+37  ;;  %v734_v7 = vand.u32 2147483647, %v1794_v43  ;;  %v715_v9 = vor.u32 1.1754944e-38, %v714_v58  ;;  %v788_v55 = vpop.permute.xlu1 %787 }
 0x20a   : > { %1184 = vrcp.f32 %v1804_v48  ;;  %vm752_vm7 = vweird.f32 %v1799_v46  ;;  %v736_v14 = vand.u32 2147483648, %v1794_v43  ;;  %v756_v16 = vand.u32 2147483647, %v1799_v46 }
 0x20b   : > { %v758_v20 = vand.u32 2147483648, %v1799_v46  ;;  %vm1868_vm13 = vcmp.eq.f32.partialorder %v734_v7, 8.507059e+37  ;;  %v780_v29 = vand.u32 2147483648, %v1804_v48  ;;  %vm774_vm3 = vweird.f32 %v1804_v48 }
 0x20c   : > { %v737_v27 = vor.u32 1.1754944e-38, %v736_v14  ;;  %v778_v34 = vand.u32 2147483647, %v1804_v48  ;;  %v633_v42 = vadd.f32 %v1780_v33, %v632_v2 }
 0x20d   : > { %v1819_v56 = vpop.eup %1178  ;;  %v759_v38 = vor.u32 1.1754944e-38, %v758_v20  ;;  %v781_v45 = vor.u32 1.1754944e-38, %v780_v29 }
 0x20e   : > { %v1181_v59 = vpop.eup %1180  ;;  %v704_v60 = vmul.f32 %v1819_v56, %v1788_v39  ;;  %vm709_vm9 = vweird.f32 %v1819_v56 }
 0x20f   : > { %v1828_v62 = vpop.eup %1182  ;;  %v726_v63 = vmul.f32 %v1181_v59, %v1794_v43  ;;  %vm731_vm10 = vweird.f32 %v1181_v59  ;;  %vm1864_vm12 = vmor %vm708_vm4, %vm709_vm9  ;;  %v573_v43 = vld [vmem:[#allocation4 + $0x10] sm:$0xff] }
 0x210   : > { %v1837_v3 = vpop.eup %1184  ;;  %v705_v4 = vsub.f32 1.0, %v704_v60  ;;  %v748_v5 = vmul.f32 %v1828_v62, %v1799_v46  ;;  %vm753_vm11 = vweird.f32 %v1828_v62  ;;  %vm732_vm15 = vmor %vm730_vm5, %vm731_vm10  ;;  %vm757_vm5 = vcmp.eq.f32.partialorder %v756_v16, 8.507059e+37  ;;  %v571_v46 = vld [vmem:[#allocation4] sm:$0xff] }
 0x211   : > { %v727_v8 = vsub.f32 1.0, %v726_v63  ;;  %v770_v10 = vmul.f32 %v1837_v3, %v1804_v48  ;;  %vm775_vm14 = vweird.f32 %v1837_v3  ;;  %vm1889_vm0 = vmor %vm752_vm7, %vm753_vm11  ;;  %vm634_vm7 = vweird.f32 %v1757_v11 }
 0x212   : > { %v749_v12 = vsub.f32 1.0, %v748_v5  ;;  %v706_v13 = vmul.f32 %v1819_v56, %v705_v4  ;;  %vm1905_vm4 = vmor %vm774_vm3, %vm775_vm14  ;;  %v638_v48 = vand.u32 2147483647, %v1757_v11  ;;  %vm811_vm10 = vcmask 254977  }
 0x213   : > { %v728_v15 = vmul.f32 %v1181_v59, %v727_v8  ;;  %v771_v17 = vsub.f32 1.0, %v770_v10  ;;  %vm1930_vm9 = vmor %vm634_vm7, %vm635_vm8  ;;  %vm818_vm11 = vcmask 256002   ;;  %vm839_vm14 = vcmask 259077  }
 0x214   : > { %v707_v18 = vadd.f32 %v1819_v56, %v706_v13  ;;  %v750_v19 = vmul.f32 %v1828_v62, %v749_v12  ;;  %v637_v11 = vsel %vm1930_vm9, %v1780_v33, %v633_v42  ;;  %vm639_vm8 = vcmp.eq.f32.partialorder %v638_v48, 8.507059e+37 }
 0x215   : > { %v729_v22 = vadd.f32 %v1181_v59, %v728_v15  ;;  %v772_v24 = vmul.f32 %v1837_v3, %v771_v17 }
 0x216   : > { %v711_v26 = vsel %vm1864_vm12, %v1819_v56, %v707_v18  ;;  %v751_v28 = vadd.f32 %v1828_v62, %v750_v19  ;;  %v641_v56 = vor.u32 1.1754944e-38, %v640_v47  ;;  %vm825_vm12 = vcmask 257027  }
 0x217   : > { %v733_v30 = vsel %vm732_vm15, %v1181_v59, %v729_v22  ;;  %v773_v32 = vadd.f32 %v1837_v3, %v772_v24  ;;  %v716_v35 = vsel %vm1842_vm6, %v715_v9, %v711_v26  ;;  %vm779_vm6 = vcmp.eq.f32.partialorder %v778_v34, 8.507059e+37 }
 0x218   : > { %v738_v36 = vsel %vm1868_vm13, %v737_v27, %v733_v30  ;;  %v755_v37 = vsel %vm1889_vm0, %v1828_v62, %v751_v28  ;;  %v718_v49 = vmul.f32 %v716_v35, %v571_v46  ;;  %v642_v59 = vsel %vm639_vm8, %v641_v56, %v637_v11 }
 0x219   : > { %v740_v40 = vmul.f32 %v738_v36, %v572_v25  ;;  %v777_v41 = vsel %vm1905_vm4, %v1837_v3, %v773_v32  ;;  %v760_v44 = vsel %vm757_vm5, %v759_v38, %v755_v37  ;;  %v790_v60 = vmul.f32 %v788_v55, %v642_v59 }
 0x21a   : > { %v782_v51 = vsel %vm779_vm6, %v781_v45, %v777_v41  ;;  %v762_v53 = vmul.f32 %v760_v44, %v573_v43  ;;  %vm832_vm13 = vcmask 258052   ;;  %vm846_vm15 = vcmask 260102  }
 0x21b   : > { %v741_v54 = vadd.f32 %v740_v40, %v718_v49  ;;  %v784_v57 = vmul.f32 %v782_v51, %v574_v50  ;;  %vm853_vm0 = vcmask 261127  }
 0x21d   : > { %v763_v58 = vadd.f32 %v762_v53, %v741_v54 }
 0x21f   : > { %v785_v33 = vadd.f32 %v784_v57, %v763_v58 }
 0x221   : > { %v791_v61 = vadd.f32 %v790_v60, %v785_v33 }
 0x223   : > { %801 = vst.msk [vmem:[%s800_s9] sm:$0x1] %vm317_vm1, %v791_v61  ;;  %1186 = vtanh.f32 %v791_v61 }
 0x224   : > { %812 = vst.msk [vmem:[%s810_s21 - $0x1] sm:$0x2] %vm811_vm10, %v791_v61 }
 0x225   : > { %819 = vst.msk [vmem:[%s817_s27 - $0x2] sm:$0x4] %vm818_vm11, %v791_v61 }
 0x226   : > { %826 = vst.msk [vmem:[%s824_s17 - $0x3] sm:$0x8] %vm825_vm12, %v791_v61 }
 0x227   : > { %833 = vst.msk [vmem:[%s831_s30 - $0x4] sm:$0x10] %vm832_vm13, %v791_v61 }
 0x228   : > { %840 = vst.msk [vmem:[%s838_s2 - $0x5] sm:$0x20] %vm839_vm14, %v791_v61 }
 0x229   : > { %v1187_v62 = vpop.eup %1186  ;;  %847 = vst.msk [vmem:[%s845_s14 - $0x6] sm:$0x40] %vm846_vm15, %v791_v61 }
 0x22a   : > { %854 = vst.msk [vmem:[%s852_s12 - $0x7] sm:$0x80] %vm853_vm0, %v791_v61  ;;  %794 = vrot.lane.b32.xlu1 %v1187_v62, %s1415_s10  ;;  %s834_s10 = scalar_lea.vmem [#allocation3], %s1940_s22 }
 0x29c   : > { %v795_v63 = vpop.permute.xlu1 %794 }
 0x29d   : > { %v797_v0 = vmul.f32 %v795_v63, %v642_v59 }
 0x29f   : > { %803 = vrot.lane.b32.xlu2 %v797_v0, %s1417_s0 }
 0x2f9   : > { %v804_v1 = vpop.permute.xlu2 %803 }
 0x2fa   : > { %807 = vst.msk [vmem:[%s806_s3] sm:$0x1] %vm317_vm1, %v804_v1 }
 0x2fb   : > { %814 = vst.msk [vmem:[%s813_s23 - $0x1] sm:$0x2] %vm811_vm10, %v804_v1 }
 0x2fc   : > { %821 = vst.msk [vmem:[%s820_s20 - $0x2] sm:$0x4] %vm818_vm11, %v804_v1 }
 0x2fd   : > { %828 = vst.msk [vmem:[%s827_s29 - $0x3] sm:$0x8] %vm825_vm12, %v804_v1  ;;  %860 = sbr.rel (%p1069_p1) target bundleno = 772 (0x304), region = 60 }
 0x2fe   : > { %835 = vst.msk [vmem:[%s834_s10 - $0x4] sm:$0x10] %vm832_vm13, %v804_v1 }
 0x2ff   : > { %842 = vst.msk [vmem:[%s841_s18 - $0x5] sm:$0x20] %vm839_vm14, %v804_v1 }
 0x300   : > { %849 = vst.msk [vmem:[%s848_s11 - $0x6] sm:$0x40] %vm846_vm15, %v804_v1 }
 0x301   : > { %856 = vst.msk [vmem:[%s855_s19 - $0x7] sm:$0x80] %vm853_vm0, %v804_v1 }
 0x302   : > { %861 = vst.msk [vmem:[#allocation15] sm:$0xff] %vm587_vm2, %v791_v61 }
 0x303   : > { %862 = vst.msk [vmem:[#allocation16] sm:$0xff] %vm587_vm2, %v804_v1 }
 0x304 PF: > { %s2096_s13 = sld [smem:[#allocation25_spill]]  ;;  %s1418_s7 = smov [#allocation15]  }
 0x305   : > { %s869_s26 = sshll.u32 %s1418_s7, 4  ;;  %s2097_s16 = sld [smem:[#allocation42_spill]]  ;;  %s870_s26 = int_to_ptr.vmem [resolvable:$true] %s869_s26 }
 0x306   : > { %s2098_s25 = sld [smem:[#allocation43_spill]]  ;;  %s1419_s28 = smov [#allocation16]  }
 0x307   : > { %s881_s9 = sshll.u32 %s1419_s28, 4  ;;  %s882_s9 = int_to_ptr.vmem [resolvable:$true] %s881_s9 }
 0x30a   : > { %p1114_p3 = scmp.eq.s32.totalorder %s2096_s13, 2 }
 0x30b   : > { %s871_s22 = sshll.u32 %s2097_s16, 4  ;;  %s872_s22 = int_to_ptr.hbm [resolvable:$true] %s871_s22 }
 0x30c   : > { %1091 = dma.vmem_to_hbm [thread:$0]  (%p1114_p3), %s870_s26, 128, %s872_s22, [#allocation11]  }
 0x30d   : > { %s883_s1 = sshll.u32 %s2098_s25, 4  ;;  %s884_s1 = int_to_ptr.hbm [resolvable:$true] %s883_s1 }
 0x30e   : > { %1093 = dma.vmem_to_hbm [thread:$0]  (%p1114_p3), %s882_s9, 128, %s884_s1, [#allocation17]  }
 0x30f   : > { %1385 = dma.done.wait (%p1114_p3), [#allocation11], 128  }
 0x310   : > { %1387 = vsyncadd (%p1114_p3), [#allocation11], 4294967168 }
 0x311   : > { %1389 = dma.done.wait (%p1114_p3), [#allocation17], 128  }
 0x312   : > { %1391 = vsyncadd (%p1114_p3), [#allocation17], 4294967168 }
 0x313 PF: > { %s2099_s1 = sld [smem:[#allocation26_spill]] }
 0x314   : > { %s2100_s13 = sld [smem:[#allocation23_spill]] }
 0x315   : > { %s2101_s0 = sld [smem:[#allocation24_spill]] }
 0x316   : > { %s2102_s14 = sld [smem:[#allocation27_spill]] }
 0x319   : > { %p35_p4 = scmp.ge.s32.totalorder %s2099_s1, 5  }
 0x31b   :  { %37 = sbr.rel (!%p35_p4) target bundleno = 17 (0x11), region = 181 }
 0x320   :  { %902 = vsyncpa [#allocation10], 1 }
 0x321   :  { %904 = vsyncpa [#allocation10 + $0x1], 1 }
 0x322   :  { %905 = vsyncpa [#allocation13], 1 }
 0x323   :  { %906 = vsyncpa [#allocation11], 1 }
 0x324   :  { %908 = vsyncpa [#allocation11 + $0x1], 1 }
 0x325   :  { %909 = vsyncpa [#allocation17], 1 }

</bundles_post_ra>
